<compile_context>
chip_gen: v6e
topology: v6e:2x2x1
jax: 0.10.0
libtpu: 0.0.40
codegen_flags: <defaults>
</compile_context>

<pallas_src>
import functools
import math

import jax
import jax.numpy as jnp
from jax.experimental import pallas as pl
from jax.experimental.pallas import tpu as pltpu


def _round_up(x, m):
    return (x + m - 1) // m * m


# ---------------------------------------------------------------------------
# Fast path: fused gather + mean + projection (embedding table VMEM-resident).
# ---------------------------------------------------------------------------
def cbow_fused_kernel(ctx_ref, emb_ref, w_ref, b_ref, out_ref, mean_scr, *, n_ctx):
    """One grid step = one (batch tile, vocab tile) block of logits.

    ctx_ref : (B_pad*C,) int32, SMEM (scalar-prefetched, flattened indices)
    emb_ref : (V_emb, D_pad) f32 VMEM  (whole table, constant block index)
    w_ref   : (D_pad, V_TILE) bf16 VMEM
    b_ref   : (1, V_TILE) f32 VMEM
    out_ref : (B_TILE, V_TILE) f32 VMEM
    mean_scr: (B_TILE, D_pad) bf16 VMEM scratch, persists across vocab tiles
    """
    i = pl.program_id(0)            # batch tile ("parallel")
    j = pl.program_id(1)            # vocab tile ("arbitrary", iterates fastest)
    b_tile = out_ref.shape[0]
    inv_c = 1.0 / n_ctx

    # Gather + mean once per batch tile, reuse for every vocab tile.
    @pl.when(j == 0)
    def _():
        base = i * (b_tile * n_ctx)

        @pl.loop(0, b_tile // 8)
        def _(g):
            rows = []
            for r in range(8):                        # static unroll: 8 rows/group
                row_base = base + (g * 8 + r) * n_ctx
                acc = emb_ref[pl.ds(ctx_ref[row_base], 1), :]          # (1, D) f32
                for c in range(1, n_ctx):              # static unroll over context
                    acc = acc + emb_ref[pl.ds(ctx_ref[row_base + c], 1), :]
                rows.append(acc * inv_c)
            off = pl.multiple_of(g * 8, 8)
            # Full 8-sublane, lane-dense store -> unmasked vst.
            mean_scr[pl.ds(off, 8), :] = jnp.concatenate(rows, axis=0).astype(
                mean_scr.dtype)

    # Projection: bf16 x bf16 on the MXU with f32 accumulation, f32 bias add.
    out_ref[...] = jnp.dot(mean_scr[...], w_ref[...],
                           preferred_element_type=jnp.float32) + b_ref[...]


# ---------------------------------------------------------------------------
# Fallback (large vocab): HBM-resident table, 4-deep DMA pipelined row gather.
# ---------------------------------------------------------------------------
def gather_mean_hbm_kernel(ctx_ref, emb_hbm, out_ref, rowbuf, sem, mean_scr, *, n_ctx):
    """One grid step = one batch tile of mean embeddings (bf16 output).

    ctx_ref : (B_pad*C,) int32 SMEM (scalar-prefetched)
    emb_hbm : (V_emb, D_pad) f32 embedding table, stays in HBM (pl.ANY)
    out_ref : (B_TILE, D_pad) bf16 VMEM output block
    rowbuf  : (N_BUF, C, D_pad) f32 VMEM scratch (N_BUF-deep pipeline)
    sem     : (N_BUF,) DMA semaphores
    mean_scr: (B_TILE, D_pad) f32 VMEM scratch (staged means, one final store)
    """
    i = pl.program_id(0)
    b_tile = out_ref.shape[0]
    n_buf = rowbuf.shape[0]
    base = i * (b_tile * n_ctx)
    inv_c = 1.0 / n_ctx

    def copy_desc(slot, c, row_idx):
        return pltpu.make_async_copy(
            emb_hbm.at[pl.ds(row_idx, 1), :],
            rowbuf.at[slot, pl.ds(c, 1), :],
            sem.at[slot])

    def start_fetch(b, slot):
        for c in range(n_ctx):
            copy_desc(slot, c, ctx_ref[base + b * n_ctx + c]).start()

    def wait_fetch(slot):
        # Dummy descriptors (row 0) are fine: wait only uses the semaphore and
        # the copy size, and every row copy has the identical (1, D) shape.
        for c in range(n_ctx):
            copy_desc(slot, c, 0).wait()

    # Prime the pipeline with n_buf - 1 rows of lookahead.
    for b0 in range(min(n_buf - 1, b_tile)):
        start_fetch(b0, b0 % n_buf)

    @pl.loop(0, b_tile)
    def _(b):
        slot = b % n_buf

        @pl.when(b + (n_buf - 1) < b_tile)
        def _():
            start_fetch(b + (n_buf - 1), (b + (n_buf - 1)) % n_buf)

        wait_fetch(slot)
        row = jnp.sum(rowbuf[slot], axis=0, keepdims=True) * inv_c   # (1, D) f32
        mean_scr[pl.ds(b, 1), :] = row

    # One full-tile unmasked bf16 store (halves stage-1 writeback bytes).
    out_ref[...] = mean_scr[...].astype(out_ref.dtype)


def projection_kernel(x_ref, w_ref, b_ref, out_ref):
    # x is already bf16 from stage 1 -> no per-step cast.
    out_ref[...] = jnp.dot(x_ref[...], w_ref[...],
                           preferred_element_type=jnp.float32) + b_ref[...]


# ---------------------------------------------------------------------------
# Wrapper
# ---------------------------------------------------------------------------
def cbow_forward(context, emb_w, proj_w, proj_b, *,
                 v_tile=2048, b_tile_max=128,
                 table_vmem_budget=8 * 1024 * 1024,
                 force_hbm_gather=False):
    """context: (B, C) int32; emb_w: (V, D) f32; proj_w: (V, D) f32; proj_b: (V,) f32."""
    B, C = context.shape
    V, D = emb_w.shape

    # ---- padding / tile selection ------------------------------------------
    D_pad = _round_up(D, 128)
    # v6e: fill the 2x256^2 MXU M-dim at large batch; otherwise <=128 rows/tile.
    B_TILE = 256 if B >= 256 else min(b_tile_max, _round_up(B, 8))
    B_pad = _round_up(B, B_TILE)
    # Lane-dense vocab tiles, multiple of 256, up to v_tile (default 2048).
    V_TILE = min(_round_up(v_tile, 256), _round_up(V, 256))
    V_pad = _round_up(V, V_TILE)
    V_emb = _round_up(V, 8)

    # ---- operand prep --------------------------------------------------------
    ctx = jnp.clip(context.astype(jnp.int32), 0, V - 1)        # guard OOB gathers
    if B_pad != B:
        ctx = jnp.pad(ctx, ((0, B_pad - B), (0, 0)))            # pad rows gather row 0
    ctx_flat = ctx.reshape(-1)                                  # 1-D -> SMEM friendly

    emb = jnp.pad(emb_w.astype(jnp.float32), ((0, V_emb - V), (0, D_pad - D)))

    w_t = jnp.pad(proj_w.astype(jnp.float32), ((0, V_pad - V), (0, D_pad - D)))
    w_t = w_t.T.astype(jnp.bfloat16)                            # (D_pad, V_pad) bf16 stream
    bias2d = jnp.pad(proj_b.astype(jnp.float32), (0, V_pad - V)).reshape(1, V_pad)

    grid = (B_pad // B_TILE, V_pad // V_TILE)
    table_bytes = V_emb * D_pad * 4

    if not force_hbm_gather and table_bytes <= table_vmem_budget:
        # ---- fast path: fused kernel, embedding table VMEM-resident ----------
        kernel = functools.partial(cbow_fused_kernel, n_ctx=C)
        logits = pl.pallas_call(
            kernel,
            out_shape=jax.ShapeDtypeStruct((B_pad, V_pad), jnp.float32),
            grid_spec=pltpu.PrefetchScalarGridSpec(
                num_scalar_prefetch=1,
                grid=grid,
                in_specs=[
                    pl.BlockSpec((V_emb, D_pad), lambda i, j, ctx_r: (0, 0)),   # whole table
                    pl.BlockSpec((D_pad, V_TILE), lambda i, j, ctx_r: (0, j)),
                    pl.BlockSpec((1, V_TILE), lambda i, j, ctx_r: (0, j)),
                ],
                out_specs=pl.BlockSpec((B_TILE, V_TILE), lambda i, j, ctx_r: (i, j)),
                scratch_shapes=[pltpu.VMEM((B_TILE, D_pad), jnp.bfloat16)],
            ),
            compiler_params=pltpu.CompilerParams(
                # Vocab axis carries the mean scratch -> "arbitrary"; batch axis
                # is "parallel" so v7x's two TensorCores split batch tiles.
                dimension_semantics=("parallel", "arbitrary"),
                vmem_limit_bytes=32 * 1024 * 1024,              # safe on v7x 64 MiB
            ),
            cost_estimate=pl.CostEstimate(
                flops=2 * B_pad * V_pad * D_pad + B_pad * C * D_pad,
                transcendentals=0,
                bytes_accessed=(table_bytes + D_pad * V_pad * 2 + V_pad * 4
                                + B_pad * V_pad * 4 + B_pad * C * 4)),
        )(ctx_flat, emb, w_t, bias2d)
        return logits[:B, :V]

    # ---- fallback: big vocab, HBM gather with deeper pipeline -----------------
    # TODO(synk): optional bf16 HBM table / int8 weight streaming (v5e/v6e) would
    # further halve the dominant DMA bytes; kept f32/bf16 for exact parity here.
    N_BUF = 4
    gather = functools.partial(gather_mean_hbm_kernel, n_ctx=C)
    mean_emb = pl.pallas_call(
        gather,
        out_shape=jax.ShapeDtypeStruct((B_pad, D_pad), jnp.bfloat16),
        grid_spec=pltpu.PrefetchScalarGridSpec(
            num_scalar_prefetch=1,
            grid=(B_pad // B_TILE,),
            in_specs=[pl.BlockSpec(memory_space=pl.ANY)],        # table stays in HBM
            out_specs=pl.BlockSpec((B_TILE, D_pad), lambda i, ctx_r: (i, 0)),
            scratch_shapes=[pltpu.VMEM((N_BUF, C, D_pad), jnp.float32),
                            pltpu.SemaphoreType.DMA((N_BUF,)),
                            pltpu.VMEM((B_TILE, D_pad), jnp.float32)],
        ),
        compiler_params=pltpu.CompilerParams(dimension_semantics=("parallel",)),
        cost_estimate=pl.CostEstimate(
            flops=B_pad * C * D_pad,
            transcendentals=0,
            bytes_accessed=B_pad * C * D_pad * 4 + B_pad * D_pad * 2 + B_pad * C * 4),
    )(ctx_flat, emb)

    logits = pl.pallas_call(
        projection_kernel,
        out_shape=jax.ShapeDtypeStruct((B_pad, V_pad), jnp.float32),
        grid=grid,
        in_specs=[pl.BlockSpec((B_TILE, D_pad), lambda i, j: (i, 0)),
                  pl.BlockSpec((D_pad, V_TILE), lambda i, j: (0, j)),
                  pl.BlockSpec((1, V_TILE), lambda i, j: (0, j))],
        out_specs=pl.BlockSpec((B_TILE, V_TILE), lambda i, j: (i, j)),
        compiler_params=pltpu.CompilerParams(
            dimension_semantics=("parallel", "parallel"),
            vmem_limit_bytes=32 * 1024 * 1024),
        cost_estimate=pl.CostEstimate(
            flops=2 * B_pad * V_pad * D_pad,
            transcendentals=0,
            bytes_accessed=(B_pad * D_pad * 2 + D_pad * V_pad * 2
                            + V_pad * 4 + B_pad * V_pad * 4)),
    )(mean_emb, w_t, bias2d)
    return logits[:B, :V]


def xavier_uniform(key, shape):
    fan_out, fan_in = shape
    bound = math.sqrt(6.0 / (fan_in + fan_out))
    return jax.random.uniform(key, shape, jnp.float32, -bound, bound)


if __name__ == "__main__":
    # Small, TPU-friendly sizes consistent with the module's forward().
    vocab_size = 1024
    embedding_dim = 128
    batch = 8
    context_size = 8

    root = jax.random.PRNGKey(0)
    k_emb, k_proj, k_ctx = jax.random.split(root, 3)

    emb_w = xavier_uniform(k_emb, (vocab_size, embedding_dim))    # Embedding weight
    proj_w = xavier_uniform(k_proj, (vocab_size, embedding_dim))  # Linear weight (out, in)
    proj_b = jnp.zeros((vocab_size,), jnp.float32)                # Linear bias zeroed

    context = jax.random.randint(
        k_ctx, (batch, context_size), 0, vocab_size, dtype=jnp.int32)

    # Pure-JAX reference (embedding lookup + mean + linear). Projection runs in
    # bf16 on the MXU, so compare with bf16-level tolerance.
    ref = jnp.take(emb_w, context, axis=0).mean(axis=1) @ proj_w.T + proj_b

    # Fast path: VMEM-resident table, fused kernel.
    out = jax.block_until_ready(cbow_forward(context, emb_w, proj_w, proj_b))
    assert out.shape == (batch, vocab_size)
    assert jnp.allclose(out, ref, atol=5e-3, rtol=5e-2), (
        float(jnp.max(jnp.abs(out - ref))))

    # Large-vocab fallback path, forced on the same small shapes to validate it.
    out_hbm = jax.block_until_ready(
        cbow_forward(context, emb_w, proj_w, proj_b, force_hbm_gather=True))
    assert jnp.allclose(out_hbm, ref, atol=5e-3, rtol=5e-2), (
        float(jnp.max(jnp.abs(out_hbm - ref))))

    print("KERNEL_OK")
</pallas_src>

<mosaic_0001>
module attributes {stable_mosaic.version = 11 : i64} {
  func.func @cbow_fused_kernel(%arg0: i32, %arg1: i32, %arg2: memref<64xi32, #tpu.memory_space<smem>>, %arg3: memref<1024x128xf32, #tpu.memory_space<vmem>>, %arg4: memref<128x1024xbf16, #tpu.memory_space<vmem>>, %arg5: memref<1x1024xf32, #tpu.memory_space<vmem>>, %arg6: memref<8x1024xf32, #tpu.memory_space<vmem>>, %arg7: memref<8x128xbf16, #tpu.memory_space<vmem>>) attributes {dimension_semantics = [#tpu.dimension_semantics<parallel>, #tpu.dimension_semantics<arbitrary>], iteration_bounds = array<i64: 1, 1>, scalar_prefetch = 1 : i64, scratch_operands = 1 : i64, tpu.core_type = #tpu.core_type<tc>, window_params = [{pipeline_mode = #tpu.pipeline_mode<synchronous>, transform_indices = @transform_0, window_bounds = array<i64: 1024, 128>}, {transform_indices = @transform_1, window_bounds = array<i64: 128, 1024>}, {transform_indices = @transform_2, window_bounds = array<i64: 1, 1024>}, {transform_indices = @transform_3, window_bounds = array<i64: 8, 1024>}]} {
    %c0_i32 = arith.constant 0 : i32
    %0 = arith.cmpi eq, %arg1, %c0_i32 : i32
    %1 = arith.extui %0 : i1 to i32
    %c0_i32_0 = arith.constant 0 : i32
    %2 = arith.cmpi ne, %1, %c0_i32_0 : i32
    scf.if %2 {
      %c64_i32 = arith.constant 64 : i32
      %10 = arith.muli %arg0, %c64_i32 : i32
      %c0_i32_8 = arith.constant 0 : i32
      %c1_i32 = arith.constant 1 : i32
      %11 = arith.muli %c0_i32_8, %c1_i32 : i32
      %c0_i32_9 = arith.constant 0 : i32
      %12 = arith.addi %c0_i32_9, %11 : i32
      %c8_i32 = arith.constant 8 : i32
      %13 = arith.muli %12, %c8_i32 : i32
      %c0_i32_10 = arith.constant 0 : i32
      %14 = arith.addi %13, %c0_i32_10 : i32
      %c8_i32_11 = arith.constant 8 : i32
      %15 = arith.muli %14, %c8_i32_11 : i32
      %16 = arith.addi %10, %15 : i32
      %17 = arith.index_cast %16 : i32 to index
      %18 = memref.load %arg2[%17] : memref<64xi32, #tpu.memory_space<smem>>
      %19 = arith.index_cast %18 : i32 to index
      %c0_12 = arith.constant 0 : index
      %20 = vector.load %arg3[%19, %c0_12] : memref<1024x128xf32, #tpu.memory_space<vmem>>, vector<1x128xf32>
      %c1_i32_13 = arith.constant 1 : i32
      %21 = arith.addi %16, %c1_i32_13 : i32
      %22 = arith.index_cast %21 : i32 to index
      %23 = memref.load %arg2[%22] : memref<64xi32, #tpu.memory_space<smem>>
      %24 = arith.index_cast %23 : i32 to index
      %c0_14 = arith.constant 0 : index
      %25 = vector.load %arg3[%24, %c0_14] : memref<1024x128xf32, #tpu.memory_space<vmem>>, vector<1x128xf32>
      %26 = arith.addf %20, %25 : vector<1x128xf32>
      %c2_i32 = arith.constant 2 : i32
      %27 = arith.addi %16, %c2_i32 : i32
      %28 = arith.index_cast %27 : i32 to index
      %29 = memref.load %arg2[%28] : memref<64xi32, #tpu.memory_space<smem>>
      %30 = arith.index_cast %29 : i32 to index
      %c0_15 = arith.constant 0 : index
      %31 = vector.load %arg3[%30, %c0_15] : memref<1024x128xf32, #tpu.memory_space<vmem>>, vector<1x128xf32>
      %32 = arith.addf %26, %31 : vector<1x128xf32>
      %c3_i32 = arith.constant 3 : i32
      %33 = arith.addi %16, %c3_i32 : i32
      %34 = arith.index_cast %33 : i32 to index
      %35 = memref.load %arg2[%34] : memref<64xi32, #tpu.memory_space<smem>>
      %36 = arith.index_cast %35 : i32 to index
      %c0_16 = arith.constant 0 : index
      %37 = vector.load %arg3[%36, %c0_16] : memref<1024x128xf32, #tpu.memory_space<vmem>>, vector<1x128xf32>
      %38 = arith.addf %32, %37 : vector<1x128xf32>
      %c4_i32 = arith.constant 4 : i32
      %39 = arith.addi %16, %c4_i32 : i32
      %40 = arith.index_cast %39 : i32 to index
      %41 = memref.load %arg2[%40] : memref<64xi32, #tpu.memory_space<smem>>
      %42 = arith.index_cast %41 : i32 to index
      %c0_17 = arith.constant 0 : index
      %43 = vector.load %arg3[%42, %c0_17] : memref<1024x128xf32, #tpu.memory_space<vmem>>, vector<1x128xf32>
      %44 = arith.addf %38, %43 : vector<1x128xf32>
      %c5_i32 = arith.constant 5 : i32
      %45 = arith.addi %16, %c5_i32 : i32
      %46 = arith.index_cast %45 : i32 to index
      %47 = memref.load %arg2[%46] : memref<64xi32, #tpu.memory_space<smem>>
      %48 = arith.index_cast %47 : i32 to index
      %c0_18 = arith.constant 0 : index
      %49 = vector.load %arg3[%48, %c0_18] : memref<1024x128xf32, #tpu.memory_space<vmem>>, vector<1x128xf32>
      %50 = arith.addf %44, %49 : vector<1x128xf32>
      %c6_i32 = arith.constant 6 : i32
      %51 = arith.addi %16, %c6_i32 : i32
      %52 = arith.index_cast %51 : i32 to index
      %53 = memref.load %arg2[%52] : memref<64xi32, #tpu.memory_space<smem>>
      %54 = arith.index_cast %53 : i32 to index
      %c0_19 = arith.constant 0 : index
      %55 = vector.load %arg3[%54, %c0_19] : memref<1024x128xf32, #tpu.memory_space<vmem>>, vector<1x128xf32>
      %56 = arith.addf %50, %55 : vector<1x128xf32>
      %c7_i32 = arith.constant 7 : i32
      %57 = arith.addi %16, %c7_i32 : i32
      %58 = arith.index_cast %57 : i32 to index
      %59 = memref.load %arg2[%58] : memref<64xi32, #tpu.memory_space<smem>>
      %60 = arith.index_cast %59 : i32 to index
      %c0_20 = arith.constant 0 : index
      %61 = vector.load %arg3[%60, %c0_20] : memref<1024x128xf32, #tpu.memory_space<vmem>>, vector<1x128xf32>
      %62 = arith.addf %56, %61 : vector<1x128xf32>
      %cst_21 = arith.constant 1.250000e-01 : f32
      %63 = vector.broadcast %cst_21 : f32 to vector<1x128xf32>
      %64 = arith.mulf %62, %63 : vector<1x128xf32>
      %c8_i32_22 = arith.constant 8 : i32
      %65 = arith.muli %12, %c8_i32_22 : i32
      %c1_i32_23 = arith.constant 1 : i32
      %66 = arith.addi %65, %c1_i32_23 : i32
      %c8_i32_24 = arith.constant 8 : i32
      %67 = arith.muli %66, %c8_i32_24 : i32
      %68 = arith.addi %10, %67 : i32
      %69 = arith.index_cast %68 : i32 to index
      %70 = memref.load %arg2[%69] : memref<64xi32, #tpu.memory_space<smem>>
      %71 = arith.index_cast %70 : i32 to index
      %c0_25 = arith.constant 0 : index
      %72 = vector.load %arg3[%71, %c0_25] : memref<1024x128xf32, #tpu.memory_space<vmem>>, vector<1x128xf32>
      %c1_i32_26 = arith.constant 1 : i32
      %73 = arith.addi %68, %c1_i32_26 : i32
      %74 = arith.index_cast %73 : i32 to index
      %75 = memref.load %arg2[%74] : memref<64xi32, #tpu.memory_space<smem>>
      %76 = arith.index_cast %75 : i32 to index
      %c0_27 = arith.constant 0 : index
      %77 = vector.load %arg3[%76, %c0_27] : memref<1024x128xf32, #tpu.memory_space<vmem>>, vector<1x128xf32>
      %78 = arith.addf %72, %77 : vector<1x128xf32>
      %c2_i32_28 = arith.constant 2 : i32
      %79 = arith.addi %68, %c2_i32_28 : i32
      %80 = arith.index_cast %79 : i32 to index
      %81 = memref.load %arg2[%80] : memref<64xi32, #tpu.memory_space<smem>>
      %82 = arith.index_cast %81 : i32 to index
      %c0_29 = arith.constant 0 : index
      %83 = vector.load %arg3[%82, %c0_29] : memref<1024x128xf32, #tpu.memory_space<vmem>>, vector<1x128xf32>
      %84 = arith.addf %78, %83 : vector<1x128xf32>
      %c3_i32_30 = arith.constant 3 : i32
      %85 = arith.addi %68, %c3_i32_30 : i32
      %86 = arith.index_cast %85 : i32 to index
      %87 = memref.load %arg2[%86] : memref<64xi32, #tpu.memory_space<smem>>
      %88 = arith.index_cast %87 : i32 to index
      %c0_31 = arith.constant 0 : index
      %89 = vector.load %arg3[%88, %c0_31] : memref<1024x128xf32, #tpu.memory_space<vmem>>, vector<1x128xf32>
      %90 = arith.addf %84, %89 : vector<1x128xf32>
      %c4_i32_32 = arith.constant 4 : i32
      %91 = arith.addi %68, %c4_i32_32 : i32
      %92 = arith.index_cast %91 : i32 to index
      %93 = memref.load %arg2[%92] : memref<64xi32, #tpu.memory_space<smem>>
      %94 = arith.index_cast %93 : i32 to index
      %c0_33 = arith.constant 0 : index
      %95 = vector.load %arg3[%94, %c0_33] : memref<1024x128xf32, #tpu.memory_space<vmem>>, vector<1x128xf32>
      %96 = arith.addf %90, %95 : vector<1x128xf32>
      %c5_i32_34 = arith.constant 5 : i32
      %97 = arith.addi %68, %c5_i32_34 : i32
      %98 = arith.index_cast %97 : i32 to index
      %99 = memref.load %arg2[%98] : memref<64xi32, #tpu.memory_space<smem>>
      %100 = arith.index_cast %99 : i32 to index
      %c0_35 = arith.constant 0 : index
      %101 = vector.load %arg3[%100, %c0_35] : memref<1024x128xf32, #tpu.memory_space<vmem>>, vector<1x128xf32>
      %102 = arith.addf %96, %101 : vector<1x128xf32>
      %c6_i32_36 = arith.constant 6 : i32
      %103 = arith.addi %68, %c6_i32_36 : i32
      %104 = arith.index_cast %103 : i32 to index
      %105 = memref.load %arg2[%104] : memref<64xi32, #tpu.memory_space<smem>>
      %106 = arith.index_cast %105 : i32 to index
      %c0_37 = arith.constant 0 : index
      %107 = vector.load %arg3[%106, %c0_37] : memref<1024x128xf32, #tpu.memory_space<vmem>>, vector<1x128xf32>
      %108 = arith.addf %102, %107 : vector<1x128xf32>
      %c7_i32_38 = arith.constant 7 : i32
      %109 = arith.addi %68, %c7_i32_38 : i32
      %110 = arith.index_cast %109 : i32 to index
      %111 = memref.load %arg2[%110] : memref<64xi32, #tpu.memory_space<smem>>
      %112 = arith.index_cast %111 : i32 to index
      %c0_39 = arith.constant 0 : index
      %113 = vector.load %arg3[%112, %c0_39] : memref<1024x128xf32, #tpu.memory_space<vmem>>, vector<1x128xf32>
      %114 = arith.addf %108, %113 : vector<1x128xf32>
      %cst_40 = arith.constant 1.250000e-01 : f32
      %115 = vector.broadcast %cst_40 : f32 to vector<1x128xf32>
      %116 = arith.mulf %114, %115 : vector<1x128xf32>
      %c8_i32_41 = arith.constant 8 : i32
      %117 = arith.muli %12, %c8_i32_41 : i32
      %c2_i32_42 = arith.constant 2 : i32
      %118 = arith.addi %117, %c2_i32_42 : i32
      %c8_i32_43 = arith.constant 8 : i32
      %119 = arith.muli %118, %c8_i32_43 : i32
      %120 = arith.addi %10, %119 : i32
      %121 = arith.index_cast %120 : i32 to index
      %122 = memref.load %arg2[%121] : memref<64xi32, #tpu.memory_space<smem>>
      %123 = arith.index_cast %122 : i32 to index
      %c0_44 = arith.constant 0 : index
      %124 = vector.load %arg3[%123, %c0_44] : memref<1024x128xf32, #tpu.memory_space<vmem>>, vector<1x128xf32>
      %c1_i32_45 = arith.constant 1 : i32
      %125 = arith.addi %120, %c1_i32_45 : i32
      %126 = arith.index_cast %125 : i32 to index
      %127 = memref.load %arg2[%126] : memref<64xi32, #tpu.memory_space<smem>>
      %128 = arith.index_cast %127 : i32 to index
      %c0_46 = arith.constant 0 : index
      %129 = vector.load %arg3[%128, %c0_46] : memref<1024x128xf32, #tpu.memory_space<vmem>>, vector<1x128xf32>
      %130 = arith.addf %124, %129 : vector<1x128xf32>
      %c2_i32_47 = arith.constant 2 : i32
      %131 = arith.addi %120, %c2_i32_47 : i32
      %132 = arith.index_cast %131 : i32 to index
      %133 = memref.load %arg2[%132] : memref<64xi32, #tpu.memory_space<smem>>
      %134 = arith.index_cast %133 : i32 to index
      %c0_48 = arith.constant 0 : index
      %135 = vector.load %arg3[%134, %c0_48] : memref<1024x128xf32, #tpu.memory_space<vmem>>, vector<1x128xf32>
      %136 = arith.addf %130, %135 : vector<1x128xf32>
      %c3_i32_49 = arith.constant 3 : i32
      %137 = arith.addi %120, %c3_i32_49 : i32
      %138 = arith.index_cast %137 : i32 to index
      %139 = memref.load %arg2[%138] : memref<64xi32, #tpu.memory_space<smem>>
      %140 = arith.index_cast %139 : i32 to index
      %c0_50 = arith.constant 0 : index
      %141 = vector.load %arg3[%140, %c0_50] : memref<1024x128xf32, #tpu.memory_space<vmem>>, vector<1x128xf32>
      %142 = arith.addf %136, %141 : vector<1x128xf32>
      %c4_i32_51 = arith.constant 4 : i32
      %143 = arith.addi %120, %c4_i32_51 : i32
      %144 = arith.index_cast %143 : i32 to index
      %145 = memref.load %arg2[%144] : memref<64xi32, #tpu.memory_space<smem>>
      %146 = arith.index_cast %145 : i32 to index
      %c0_52 = arith.constant 0 : index
      %147 = vector.load %arg3[%146, %c0_52] : memref<1024x128xf32, #tpu.memory_space<vmem>>, vector<1x128xf32>
      %148 = arith.addf %142, %147 : vector<1x128xf32>
      %c5_i32_53 = arith.constant 5 : i32
      %149 = arith.addi %120, %c5_i32_53 : i32
      %150 = arith.index_cast %149 : i32 to index
      %151 = memref.load %arg2[%150] : memref<64xi32, #tpu.memory_space<smem>>
      %152 = arith.index_cast %151 : i32 to index
      %c0_54 = arith.constant 0 : index
      %153 = vector.load %arg3[%152, %c0_54] : memref<1024x128xf32, #tpu.memory_space<vmem>>, vector<1x128xf32>
      %154 = arith.addf %148, %153 : vector<1x128xf32>
      %c6_i32_55 = arith.constant 6 : i32
      %155 = arith.addi %120, %c6_i32_55 : i32
      %156 = arith.index_cast %155 : i32 to index
      %157 = memref.load %arg2[%156] : memref<64xi32, #tpu.memory_space<smem>>
      %158 = arith.index_cast %157 : i32 to index
      %c0_56 = arith.constant 0 : index
      %159 = vector.load %arg3[%158, %c0_56] : memref<1024x128xf32, #tpu.memory_space<vmem>>, vector<1x128xf32>
      %160 = arith.addf %154, %159 : vector<1x128xf32>
      %c7_i32_57 = arith.constant 7 : i32
      %161 = arith.addi %120, %c7_i32_57 : i32
      %162 = arith.index_cast %161 : i32 to index
      %163 = memref.load %arg2[%162] : memref<64xi32, #tpu.memory_space<smem>>
      %164 = arith.index_cast %163 : i32 to index
      %c0_58 = arith.constant 0 : index
      %165 = vector.load %arg3[%164, %c0_58] : memref<1024x128xf32, #tpu.memory_space<vmem>>, vector<1x128xf32>
      %166 = arith.addf %160, %165 : vector<1x128xf32>
      %cst_59 = arith.constant 1.250000e-01 : f32
      %167 = vector.broadcast %cst_59 : f32 to vector<1x128xf32>
      %168 = arith.mulf %166, %167 : vector<1x128xf32>
      %c8_i32_60 = arith.constant 8 : i32
      %169 = arith.muli %12, %c8_i32_60 : i32
      %c3_i32_61 = arith.constant 3 : i32
      %170 = arith.addi %169, %c3_i32_61 : i32
      %c8_i32_62 = arith.constant 8 : i32
      %171 = arith.muli %170, %c8_i32_62 : i32
      %172 = arith.addi %10, %171 : i32
      %173 = arith.index_cast %172 : i32 to index
      %174 = memref.load %arg2[%173] : memref<64xi32, #tpu.memory_space<smem>>
      %175 = arith.index_cast %174 : i32 to index
      %c0_63 = arith.constant 0 : index
      %176 = vector.load %arg3[%175, %c0_63] : memref<1024x128xf32, #tpu.memory_space<vmem>>, vector<1x128xf32>
      %c1_i32_64 = arith.constant 1 : i32
      %177 = arith.addi %172, %c1_i32_64 : i32
      %178 = arith.index_cast %177 : i32 to index
      %179 = memref.load %arg2[%178] : memref<64xi32, #tpu.memory_space<smem>>
      %180 = arith.index_cast %179 : i32 to index
      %c0_65 = arith.constant 0 : index
      %181 = vector.load %arg3[%180, %c0_65] : memref<1024x128xf32, #tpu.memory_space<vmem>>, vector<1x128xf32>
      %182 = arith.addf %176, %181 : vector<1x128xf32>
      %c2_i32_66 = arith.constant 2 : i32
      %183 = arith.addi %172, %c2_i32_66 : i32
      %184 = arith.index_cast %183 : i32 to index
      %185 = memref.load %arg2[%184] : memref<64xi32, #tpu.memory_space<smem>>
      %186 = arith.index_cast %185 : i32 to index
      %c0_67 = arith.constant 0 : index
      %187 = vector.load %arg3[%186, %c0_67] : memref<1024x128xf32, #tpu.memory_space<vmem>>, vector<1x128xf32>
      %188 = arith.addf %182, %187 : vector<1x128xf32>
      %c3_i32_68 = arith.constant 3 : i32
      %189 = arith.addi %172, %c3_i32_68 : i32
      %190 = arith.index_cast %189 : i32 to index
      %191 = memref.load %arg2[%190] : memref<64xi32, #tpu.memory_space<smem>>
      %192 = arith.index_cast %191 : i32 to index
      %c0_69 = arith.constant 0 : index
      %193 = vector.load %arg3[%192, %c0_69] : memref<1024x128xf32, #tpu.memory_space<vmem>>, vector<1x128xf32>
      %194 = arith.addf %188, %193 : vector<1x128xf32>
      %c4_i32_70 = arith.constant 4 : i32
      %195 = arith.addi %172, %c4_i32_70 : i32
      %196 = arith.index_cast %195 : i32 to index
      %197 = memref.load %arg2[%196] : memref<64xi32, #tpu.memory_space<smem>>
      %198 = arith.index_cast %197 : i32 to index
      %c0_71 = arith.constant 0 : index
      %199 = vector.load %arg3[%198, %c0_71] : memref<1024x128xf32, #tpu.memory_space<vmem>>, vector<1x128xf32>
      %200 = arith.addf %194, %199 : vector<1x128xf32>
      %c5_i32_72 = arith.constant 5 : i32
      %201 = arith.addi %172, %c5_i32_72 : i32
      %202 = arith.index_cast %201 : i32 to index
      %203 = memref.load %arg2[%202] : memref<64xi32, #tpu.memory_space<smem>>
      %204 = arith.index_cast %203 : i32 to index
      %c0_73 = arith.constant 0 : index
      %205 = vector.load %arg3[%204, %c0_73] : memref<1024x128xf32, #tpu.memory_space<vmem>>, vector<1x128xf32>
      %206 = arith.addf %200, %205 : vector<1x128xf32>
      %c6_i32_74 = arith.constant 6 : i32
      %207 = arith.addi %172, %c6_i32_74 : i32
      %208 = arith.index_cast %207 : i32 to index
      %209 = memref.load %arg2[%208] : memref<64xi32, #tpu.memory_space<smem>>
      %210 = arith.index_cast %209 : i32 to index
      %c0_75 = arith.constant 0 : index
      %211 = vector.load %arg3[%210, %c0_75] : memref<1024x128xf32, #tpu.memory_space<vmem>>, vector<1x128xf32>
      %212 = arith.addf %206, %211 : vector<1x128xf32>
      %c7_i32_76 = arith.constant 7 : i32
      %213 = arith.addi %172, %c7_i32_76 : i32
      %214 = arith.index_cast %213 : i32 to index
      %215 = memref.load %arg2[%214] : memref<64xi32, #tpu.memory_space<smem>>
      %216 = arith.index_cast %215 : i32 to index
      %c0_77 = arith.constant 0 : index
      %217 = vector.load %arg3[%216, %c0_77] : memref<1024x128xf32, #tpu.memory_space<vmem>>, vector<1x128xf32>
      %218 = arith.addf %212, %217 : vector<1x128xf32>
      %cst_78 = arith.constant 1.250000e-01 : f32
      %219 = vector.broadcast %cst_78 : f32 to vector<1x128xf32>
      %220 = arith.mulf %218, %219 : vector<1x128xf32>
      %c8_i32_79 = arith.constant 8 : i32
      %221 = arith.muli %12, %c8_i32_79 : i32
      %c4_i32_80 = arith.constant 4 : i32
      %222 = arith.addi %221, %c4_i32_80 : i32
      %c8_i32_81 = arith.constant 8 : i32
      %223 = arith.muli %222, %c8_i32_81 : i32
      %224 = arith.addi %10, %223 : i32
      %225 = arith.index_cast %224 : i32 to index
      %226 = memref.load %arg2[%225] : memref<64xi32, #tpu.memory_space<smem>>
      %227 = arith.index_cast %226 : i32 to index
      %c0_82 = arith.constant 0 : index
      %228 = vector.load %arg3[%227, %c0_82] : memref<1024x128xf32, #tpu.memory_space<vmem>>, vector<1x128xf32>
      %c1_i32_83 = arith.constant 1 : i32
      %229 = arith.addi %224, %c1_i32_83 : i32
      %230 = arith.index_cast %229 : i32 to index
      %231 = memref.load %arg2[%230] : memref<64xi32, #tpu.memory_space<smem>>
      %232 = arith.index_cast %231 : i32 to index
      %c0_84 = arith.constant 0 : index
      %233 = vector.load %arg3[%232, %c0_84] : memref<1024x128xf32, #tpu.memory_space<vmem>>, vector<1x128xf32>
      %234 = arith.addf %228, %233 : vector<1x128xf32>
      %c2_i32_85 = arith.constant 2 : i32
      %235 = arith.addi %224, %c2_i32_85 : i32
      %236 = arith.index_cast %235 : i32 to index
      %237 = memref.load %arg2[%236] : memref<64xi32, #tpu.memory_space<smem>>
      %238 = arith.index_cast %237 : i32 to index
      %c0_86 = arith.constant 0 : index
      %239 = vector.load %arg3[%238, %c0_86] : memref<1024x128xf32, #tpu.memory_space<vmem>>, vector<1x128xf32>
      %240 = arith.addf %234, %239 : vector<1x128xf32>
      %c3_i32_87 = arith.constant 3 : i32
      %241 = arith.addi %224, %c3_i32_87 : i32
      %242 = arith.index_cast %241 : i32 to index
      %243 = memref.load %arg2[%242] : memref<64xi32, #tpu.memory_space<smem>>
      %244 = arith.index_cast %243 : i32 to index
      %c0_88 = arith.constant 0 : index
      %245 = vector.load %arg3[%244, %c0_88] : memref<1024x128xf32, #tpu.memory_space<vmem>>, vector<1x128xf32>
      %246 = arith.addf %240, %245 : vector<1x128xf32>
      %c4_i32_89 = arith.constant 4 : i32
      %247 = arith.addi %224, %c4_i32_89 : i32
      %248 = arith.index_cast %247 : i32 to index
      %249 = memref.load %arg2[%248] : memref<64xi32, #tpu.memory_space<smem>>
      %250 = arith.index_cast %249 : i32 to index
      %c0_90 = arith.constant 0 : index
      %251 = vector.load %arg3[%250, %c0_90] : memref<1024x128xf32, #tpu.memory_space<vmem>>, vector<1x128xf32>
      %252 = arith.addf %246, %251 : vector<1x128xf32>
      %c5_i32_91 = arith.constant 5 : i32
      %253 = arith.addi %224, %c5_i32_91 : i32
      %254 = arith.index_cast %253 : i32 to index
      %255 = memref.load %arg2[%254] : memref<64xi32, #tpu.memory_space<smem>>
      %256 = arith.index_cast %255 : i32 to index
      %c0_92 = arith.constant 0 : index
      %257 = vector.load %arg3[%256, %c0_92] : memref<1024x128xf32, #tpu.memory_space<vmem>>, vector<1x128xf32>
      %258 = arith.addf %252, %257 : vector<1x128xf32>
      %c6_i32_93 = arith.constant 6 : i32
      %259 = arith.addi %224, %c6_i32_93 : i32
      %260 = arith.index_cast %259 : i32 to index
      %261 = memref.load %arg2[%260] : memref<64xi32, #tpu.memory_space<smem>>
      %262 = arith.index_cast %261 : i32 to index
      %c0_94 = arith.constant 0 : index
      %263 = vector.load %arg3[%262, %c0_94] : memref<1024x128xf32, #tpu.memory_space<vmem>>, vector<1x128xf32>
      %264 = arith.addf %258, %263 : vector<1x128xf32>
      %c7_i32_95 = arith.constant 7 : i32
      %265 = arith.addi %224, %c7_i32_95 : i32
      %266 = arith.index_cast %265 : i32 to index
      %267 = memref.load %arg2[%266] : memref<64xi32, #tpu.memory_space<smem>>
      %268 = arith.index_cast %267 : i32 to index
      %c0_96 = arith.constant 0 : index
      %269 = vector.load %arg3[%268, %c0_96] : memref<1024x128xf32, #tpu.memory_space<vmem>>, vector<1x128xf32>
      %270 = arith.addf %264, %269 : vector<1x128xf32>
      %cst_97 = arith.constant 1.250000e-01 : f32
      %271 = vector.broadcast %cst_97 : f32 to vector<1x128xf32>
      %272 = arith.mulf %270, %271 : vector<1x128xf32>
      %c8_i32_98 = arith.constant 8 : i32
      %273 = arith.muli %12, %c8_i32_98 : i32
      %c5_i32_99 = arith.constant 5 : i32
      %274 = arith.addi %273, %c5_i32_99 : i32
      %c8_i32_100 = arith.constant 8 : i32
      %275 = arith.muli %274, %c8_i32_100 : i32
      %276 = arith.addi %10, %275 : i32
      %277 = arith.index_cast %276 : i32 to index
      %278 = memref.load %arg2[%277] : memref<64xi32, #tpu.memory_space<smem>>
      %279 = arith.index_cast %278 : i32 to index
      %c0_101 = arith.constant 0 : index
      %280 = vector.load %arg3[%279, %c0_101] : memref<1024x128xf32, #tpu.memory_space<vmem>>, vector<1x128xf32>
      %c1_i32_102 = arith.constant 1 : i32
      %281 = arith.addi %276, %c1_i32_102 : i32
      %282 = arith.index_cast %281 : i32 to index
      %283 = memref.load %arg2[%282] : memref<64xi32, #tpu.memory_space<smem>>
      %284 = arith.index_cast %283 : i32 to index
      %c0_103 = arith.constant 0 : index
      %285 = vector.load %arg3[%284, %c0_103] : memref<1024x128xf32, #tpu.memory_space<vmem>>, vector<1x128xf32>
      %286 = arith.addf %280, %285 : vector<1x128xf32>
      %c2_i32_104 = arith.constant 2 : i32
      %287 = arith.addi %276, %c2_i32_104 : i32
      %288 = arith.index_cast %287 : i32 to index
      %289 = memref.load %arg2[%288] : memref<64xi32, #tpu.memory_space<smem>>
      %290 = arith.index_cast %289 : i32 to index
      %c0_105 = arith.constant 0 : index
      %291 = vector.load %arg3[%290, %c0_105] : memref<1024x128xf32, #tpu.memory_space<vmem>>, vector<1x128xf32>
      %292 = arith.addf %286, %291 : vector<1x128xf32>
      %c3_i32_106 = arith.constant 3 : i32
      %293 = arith.addi %276, %c3_i32_106 : i32
      %294 = arith.index_cast %293 : i32 to index
      %295 = memref.load %arg2[%294] : memref<64xi32, #tpu.memory_space<smem>>
      %296 = arith.index_cast %295 : i32 to index
      %c0_107 = arith.constant 0 : index
      %297 = vector.load %arg3[%296, %c0_107] : memref<1024x128xf32, #tpu.memory_space<vmem>>, vector<1x128xf32>
      %298 = arith.addf %292, %297 : vector<1x128xf32>
      %c4_i32_108 = arith.constant 4 : i32
      %299 = arith.addi %276, %c4_i32_108 : i32
      %300 = arith.index_cast %299 : i32 to index
      %301 = memref.load %arg2[%300] : memref<64xi32, #tpu.memory_space<smem>>
      %302 = arith.index_cast %301 : i32 to index
      %c0_109 = arith.constant 0 : index
      %303 = vector.load %arg3[%302, %c0_109] : memref<1024x128xf32, #tpu.memory_space<vmem>>, vector<1x128xf32>
      %304 = arith.addf %298, %303 : vector<1x128xf32>
      %c5_i32_110 = arith.constant 5 : i32
      %305 = arith.addi %276, %c5_i32_110 : i32
      %306 = arith.index_cast %305 : i32 to index
      %307 = memref.load %arg2[%306] : memref<64xi32, #tpu.memory_space<smem>>
      %308 = arith.index_cast %307 : i32 to index
      %c0_111 = arith.constant 0 : index
      %309 = vector.load %arg3[%308, %c0_111] : memref<1024x128xf32, #tpu.memory_space<vmem>>, vector<1x128xf32>
      %310 = arith.addf %304, %309 : vector<1x128xf32>
      %c6_i32_112 = arith.constant 6 : i32
      %311 = arith.addi %276, %c6_i32_112 : i32
      %312 = arith.index_cast %311 : i32 to index
      %313 = memref.load %arg2[%312] : memref<64xi32, #tpu.memory_space<smem>>
      %314 = arith.index_cast %313 : i32 to index
      %c0_113 = arith.constant 0 : index
      %315 = vector.load %arg3[%314, %c0_113] : memref<1024x128xf32, #tpu.memory_space<vmem>>, vector<1x128xf32>
      %316 = arith.addf %310, %315 : vector<1x128xf32>
      %c7_i32_114 = arith.constant 7 : i32
      %317 = arith.addi %276, %c7_i32_114 : i32
      %318 = arith.index_cast %317 : i32 to index
      %319 = memref.load %arg2[%318] : memref<64xi32, #tpu.memory_space<smem>>
      %320 = arith.index_cast %319 : i32 to index
      %c0_115 = arith.constant 0 : index
      %321 = vector.load %arg3[%320, %c0_115] : memref<1024x128xf32, #tpu.memory_space<vmem>>, vector<1x128xf32>
      %322 = arith.addf %316, %321 : vector<1x128xf32>
      %cst_116 = arith.constant 1.250000e-01 : f32
      %323 = vector.broadcast %cst_116 : f32 to vector<1x128xf32>
      %324 = arith.mulf %322, %323 : vector<1x128xf32>
      %c8_i32_117 = arith.constant 8 : i32
      %325 = arith.muli %12, %c8_i32_117 : i32
      %c6_i32_118 = arith.constant 6 : i32
      %326 = arith.addi %325, %c6_i32_118 : i32
      %c8_i32_119 = arith.constant 8 : i32
      %327 = arith.muli %326, %c8_i32_119 : i32
      %328 = arith.addi %10, %327 : i32
      %329 = arith.index_cast %328 : i32 to index
      %330 = memref.load %arg2[%329] : memref<64xi32, #tpu.memory_space<smem>>
      %331 = arith.index_cast %330 : i32 to index
      %c0_120 = arith.constant 0 : index
      %332 = vector.load %arg3[%331, %c0_120] : memref<1024x128xf32, #tpu.memory_space<vmem>>, vector<1x128xf32>
      %c1_i32_121 = arith.constant 1 : i32
      %333 = arith.addi %328, %c1_i32_121 : i32
      %334 = arith.index_cast %333 : i32 to index
      %335 = memref.load %arg2[%334] : memref<64xi32, #tpu.memory_space<smem>>
      %336 = arith.index_cast %335 : i32 to index
      %c0_122 = arith.constant 0 : index
      %337 = vector.load %arg3[%336, %c0_122] : memref<1024x128xf32, #tpu.memory_space<vmem>>, vector<1x128xf32>
      %338 = arith.addf %332, %337 : vector<1x128xf32>
      %c2_i32_123 = arith.constant 2 : i32
      %339 = arith.addi %328, %c2_i32_123 : i32
      %340 = arith.index_cast %339 : i32 to index
      %341 = memref.load %arg2[%340] : memref<64xi32, #tpu.memory_space<smem>>
      %342 = arith.index_cast %341 : i32 to index
      %c0_124 = arith.constant 0 : index
      %343 = vector.load %arg3[%342, %c0_124] : memref<1024x128xf32, #tpu.memory_space<vmem>>, vector<1x128xf32>
      %344 = arith.addf %338, %343 : vector<1x128xf32>
      %c3_i32_125 = arith.constant 3 : i32
      %345 = arith.addi %328, %c3_i32_125 : i32
      %346 = arith.index_cast %345 : i32 to index
      %347 = memref.load %arg2[%346] : memref<64xi32, #tpu.memory_space<smem>>
      %348 = arith.index_cast %347 : i32 to index
      %c0_126 = arith.constant 0 : index
      %349 = vector.load %arg3[%348, %c0_126] : memref<1024x128xf32, #tpu.memory_space<vmem>>, vector<1x128xf32>
      %350 = arith.addf %344, %349 : vector<1x128xf32>
      %c4_i32_127 = arith.constant 4 : i32
      %351 = arith.addi %328, %c4_i32_127 : i32
      %352 = arith.index_cast %351 : i32 to index
      %353 = memref.load %arg2[%352] : memref<64xi32, #tpu.memory_space<smem>>
      %354 = arith.index_cast %353 : i32 to index
      %c0_128 = arith.constant 0 : index
      %355 = vector.load %arg3[%354, %c0_128] : memref<1024x128xf32, #tpu.memory_space<vmem>>, vector<1x128xf32>
      %356 = arith.addf %350, %355 : vector<1x128xf32>
      %c5_i32_129 = arith.constant 5 : i32
      %357 = arith.addi %328, %c5_i32_129 : i32
      %358 = arith.index_cast %357 : i32 to index
      %359 = memref.load %arg2[%358] : memref<64xi32, #tpu.memory_space<smem>>
      %360 = arith.index_cast %359 : i32 to index
      %c0_130 = arith.constant 0 : index
      %361 = vector.load %arg3[%360, %c0_130] : memref<1024x128xf32, #tpu.memory_space<vmem>>, vector<1x128xf32>
      %362 = arith.addf %356, %361 : vector<1x128xf32>
      %c6_i32_131 = arith.constant 6 : i32
      %363 = arith.addi %328, %c6_i32_131 : i32
      %364 = arith.index_cast %363 : i32 to index
      %365 = memref.load %arg2[%364] : memref<64xi32, #tpu.memory_space<smem>>
      %366 = arith.index_cast %365 : i32 to index
      %c0_132 = arith.constant 0 : index
      %367 = vector.load %arg3[%366, %c0_132] : memref<1024x128xf32, #tpu.memory_space<vmem>>, vector<1x128xf32>
      %368 = arith.addf %362, %367 : vector<1x128xf32>
      %c7_i32_133 = arith.constant 7 : i32
      %369 = arith.addi %328, %c7_i32_133 : i32
      %370 = arith.index_cast %369 : i32 to index
      %371 = memref.load %arg2[%370] : memref<64xi32, #tpu.memory_space<smem>>
      %372 = arith.index_cast %371 : i32 to index
      %c0_134 = arith.constant 0 : index
      %373 = vector.load %arg3[%372, %c0_134] : memref<1024x128xf32, #tpu.memory_space<vmem>>, vector<1x128xf32>
      %374 = arith.addf %368, %373 : vector<1x128xf32>
      %cst_135 = arith.constant 1.250000e-01 : f32
      %375 = vector.broadcast %cst_135 : f32 to vector<1x128xf32>
      %376 = arith.mulf %374, %375 : vector<1x128xf32>
      %c8_i32_136 = arith.constant 8 : i32
      %377 = arith.muli %12, %c8_i32_136 : i32
      %c7_i32_137 = arith.constant 7 : i32
      %378 = arith.addi %377, %c7_i32_137 : i32
      %c8_i32_138 = arith.constant 8 : i32
      %379 = arith.muli %378, %c8_i32_138 : i32
      %380 = arith.addi %10, %379 : i32
      %381 = arith.index_cast %380 : i32 to index
      %382 = memref.load %arg2[%381] : memref<64xi32, #tpu.memory_space<smem>>
      %383 = arith.index_cast %382 : i32 to index
      %c0_139 = arith.constant 0 : index
      %384 = vector.load %arg3[%383, %c0_139] : memref<1024x128xf32, #tpu.memory_space<vmem>>, vector<1x128xf32>
      %c1_i32_140 = arith.constant 1 : i32
      %385 = arith.addi %380, %c1_i32_140 : i32
      %386 = arith.index_cast %385 : i32 to index
      %387 = memref.load %arg2[%386] : memref<64xi32, #tpu.memory_space<smem>>
      %388 = arith.index_cast %387 : i32 to index
      %c0_141 = arith.constant 0 : index
      %389 = vector.load %arg3[%388, %c0_141] : memref<1024x128xf32, #tpu.memory_space<vmem>>, vector<1x128xf32>
      %390 = arith.addf %384, %389 : vector<1x128xf32>
      %c2_i32_142 = arith.constant 2 : i32
      %391 = arith.addi %380, %c2_i32_142 : i32
      %392 = arith.index_cast %391 : i32 to index
      %393 = memref.load %arg2[%392] : memref<64xi32, #tpu.memory_space<smem>>
      %394 = arith.index_cast %393 : i32 to index
      %c0_143 = arith.constant 0 : index
      %395 = vector.load %arg3[%394, %c0_143] : memref<1024x128xf32, #tpu.memory_space<vmem>>, vector<1x128xf32>
      %396 = arith.addf %390, %395 : vector<1x128xf32>
      %c3_i32_144 = arith.constant 3 : i32
      %397 = arith.addi %380, %c3_i32_144 : i32
      %398 = arith.index_cast %397 : i32 to index
      %399 = memref.load %arg2[%398] : memref<64xi32, #tpu.memory_space<smem>>
      %400 = arith.index_cast %399 : i32 to index
      %c0_145 = arith.constant 0 : index
      %401 = vector.load %arg3[%400, %c0_145] : memref<1024x128xf32, #tpu.memory_space<vmem>>, vector<1x128xf32>
      %402 = arith.addf %396, %401 : vector<1x128xf32>
      %c4_i32_146 = arith.constant 4 : i32
      %403 = arith.addi %380, %c4_i32_146 : i32
      %404 = arith.index_cast %403 : i32 to index
      %405 = memref.load %arg2[%404] : memref<64xi32, #tpu.memory_space<smem>>
      %406 = arith.index_cast %405 : i32 to index
      %c0_147 = arith.constant 0 : index
      %407 = vector.load %arg3[%406, %c0_147] : memref<1024x128xf32, #tpu.memory_space<vmem>>, vector<1x128xf32>
      %408 = arith.addf %402, %407 : vector<1x128xf32>
      %c5_i32_148 = arith.constant 5 : i32
      %409 = arith.addi %380, %c5_i32_148 : i32
      %410 = arith.index_cast %409 : i32 to index
      %411 = memref.load %arg2[%410] : memref<64xi32, #tpu.memory_space<smem>>
      %412 = arith.index_cast %411 : i32 to index
      %c0_149 = arith.constant 0 : index
      %413 = vector.load %arg3[%412, %c0_149] : memref<1024x128xf32, #tpu.memory_space<vmem>>, vector<1x128xf32>
      %414 = arith.addf %408, %413 : vector<1x128xf32>
      %c6_i32_150 = arith.constant 6 : i32
      %415 = arith.addi %380, %c6_i32_150 : i32
      %416 = arith.index_cast %415 : i32 to index
      %417 = memref.load %arg2[%416] : memref<64xi32, #tpu.memory_space<smem>>
      %418 = arith.index_cast %417 : i32 to index
      %c0_151 = arith.constant 0 : index
      %419 = vector.load %arg3[%418, %c0_151] : memref<1024x128xf32, #tpu.memory_space<vmem>>, vector<1x128xf32>
      %420 = arith.addf %414, %419 : vector<1x128xf32>
      %c7_i32_152 = arith.constant 7 : i32
      %421 = arith.addi %380, %c7_i32_152 : i32
      %422 = arith.index_cast %421 : i32 to index
      %423 = memref.load %arg2[%422] : memref<64xi32, #tpu.memory_space<smem>>
      %424 = arith.index_cast %423 : i32 to index
      %c0_153 = arith.constant 0 : index
      %425 = vector.load %arg3[%424, %c0_153] : memref<1024x128xf32, #tpu.memory_space<vmem>>, vector<1x128xf32>
      %426 = arith.addf %420, %425 : vector<1x128xf32>
      %cst_154 = arith.constant 1.250000e-01 : f32
      %427 = vector.broadcast %cst_154 : f32 to vector<1x128xf32>
      %428 = arith.mulf %426, %427 : vector<1x128xf32>
      %c8_i32_155 = arith.constant 8 : i32
      %429 = arith.muli %12, %c8_i32_155 : i32
      %430 = tpu.assume_multiple %429, 8 : i32
      %431 = tpu.concatenate %64, %116, %168, %220, %272, %324, %376, %428 in 0 : vector<1x128xf32>, vector<1x128xf32>, vector<1x128xf32>, vector<1x128xf32>, vector<1x128xf32>, vector<1x128xf32>, vector<1x128xf32>, vector<1x128xf32> -> vector<8x128xf32>
      %432 = arith.truncf %431 : vector<8x128xf32> to vector<8x128xbf16>
      %433 = arith.index_cast %430 : i32 to index
      %c0_156 = arith.constant 0 : index
      %434 = vector.load %arg7[%433, %c0_156] : memref<8x128xbf16, #tpu.memory_space<vmem>>, vector<8x128xbf16>
      tpu.vector_store %arg7[%433, %c0_156], %432 {strides = array<i32>} : memref<8x128xbf16, #tpu.memory_space<vmem>>, vector<8x128xbf16>,
      %c1_i32_157 = arith.constant 1 : i32
    } else {
    }
    %c0 = arith.constant 0 : index
    %c0_1 = arith.constant 0 : index
    %3 = vector.load %arg7[%c0, %c0_1] : memref<8x128xbf16, #tpu.memory_space<vmem>>, vector<8x128xbf16>
    %c0_2 = arith.constant 0 : index
    %c0_3 = arith.constant 0 : index
    %4 = vector.load %arg4[%c0_2, %c0_3] : memref<128x1024xbf16, #tpu.memory_space<vmem>>, vector<128x1024xbf16>
    %cst = arith.constant dense<0.000000e+00> : vector<8x1024xf32>
    %5 = tpu.matmul %3, %4, %cst {dimension_numbers = #tpu.dot_dimension_numbers<[1], [0], [0], [1], [0, 0, 1, 1], [], []>} : vector<8x128xbf16>, vector<128x1024xbf16>, vector<8x1024xf32> -> vector<8x1024xf32>
    %c0_4 = arith.constant 0 : index
    %c0_5 = arith.constant 0 : index
    %6 = vector.load %arg5[%c0_4, %c0_5] : memref<1x1024xf32, #tpu.memory_space<vmem>>, vector<1x1024xf32>
    %7 = vector.broadcast %6 : vector<1x1024xf32> to vector<8x1024xf32>
    %8 = arith.addf %5, %7 : vector<8x1024xf32>
    %c0_6 = arith.constant 0 : index
    %c0_7 = arith.constant 0 : index
    %9 = vector.load %arg6[%c0_6, %c0_7] : memref<8x1024xf32, #tpu.memory_space<vmem>>, vector<8x1024xf32>
    tpu.vector_store %arg6[%c0_6, %c0_7], %8 {strides = array<i32>} : memref<8x1024xf32, #tpu.memory_space<vmem>>, vector<8x1024xf32>,
    return
  }
  func.func @transform_0(%arg0: i32, %arg1: i32, %arg2: memref<64xi32, #tpu.memory_space<smem>>) -> (i32, i32) {
    %c0_i32 = arith.constant 0 : i32
    %c0_i32_0 = arith.constant 0 : i32
    %c0_i32_1 = arith.constant 0 : i32
    return %c0_i32, %c0_i32_0 : i32, i32
  }
  func.func @transform_1(%arg0: i32, %arg1: i32, %arg2: memref<64xi32, #tpu.memory_space<smem>>) -> (i32, i32) {
    %c0_i32 = arith.constant 0 : i32
    %c0_i32_0 = arith.constant 0 : i32
    return %c0_i32, %arg1 : i32, i32
  }
  func.func @transform_2(%arg0: i32, %arg1: i32, %arg2: memref<64xi32, #tpu.memory_space<smem>>) -> (i32, i32) {
    %c0_i32 = arith.constant 0 : i32
    %c0_i32_0 = arith.constant 0 : i32
    return %c0_i32, %arg1 : i32, i32
  }
  func.func @transform_3(%arg0: i32, %arg1: i32, %arg2: memref<64xi32, #tpu.memory_space<smem>>) -> (i32, i32) {
    %c0_i32 = arith.constant 0 : i32
    return %arg0, %arg1 : i32, i32
  }
}

</mosaic_0001>

<bundles_post_ra>
// kernel: tpu_custom_call.1
= control target key start
LH: loop header
LB: loop body
LE: loop exit
PB: predicated region body
PF: predicated region fallthrough
CT: control target
= control target key end

     0   :  { %s1333_s15 = smov [#allocation4]   ;;  %s1603_s0 = inlined_call_operand.hbm [shape: s32[64], index: 0, kind: input, shape index: {}]   ;;  %s1604_s1 = inlined_call_operand.hbm [shape: f32[1024,128], index: 1, kind: input, shape index: {}]   ;;  %s1605_s2 = inlined_call_operand.hbm [shape: bf16[128,1024], index: 2, kind: input, shape index: {}]   ;;  %s1606_s3 = inlined_call_operand.hbm [shape: f32[1,1024], index: 3, kind: input, shape index: {}]   ;;  %s1607_s4 = inlined_call_operand.hbm [shape: f32[8,1024], index: 4, kind: output, shape index: {}]  }
   0x1   :  { %1608 = sst [smem:[#allocation17_spill]] %s1607_s4 }
   0x2   :  { %10 = dma.hbm_to_smem %s1603_s0, 16, %s1333_s15, [#allocation3] }
   0x3   :  { %1325 = dma.done.wait [#allocation3], 16 }
   0x4   :  { %1326 = vsyncadd [#allocation3], 4294967280 }
   0x5   :  { %12 = sfence }
   0x6   :  { %13 = vsyncpa [#allocation6], 0 }
   0x7   :  { %14 = vsyncpa [#allocation9], 0 }
   0x8   :  { %15 = vsyncpa [#allocation7], 0  ;;  %s1334_s18 = smov [#allocation8]  }
   0x9   :  { %s33_s19 = sshll.u32 %s1334_s18, 4  ;;  %s34_s19 = int_to_ptr.vmem [resolvable:$true] %s33_s19 }
   0xa   :  { %s1253_s20 = scalar_lea.vmem %s34_s19, 8192  ;;  %p1258_p1 = scmp.lt.s32.totalorder %s34_s19, %s34_s19 }
   0xb   :  { %p1254_p0 = scmp.ne.s32.totalorder %s34_s19, %s1253_s20  ;;  %p1259_p2 = scmp.lt.s32.totalorder %s1253_s20, %s1253_s20 }
   0xd   :  { %p1260_p3 = por %p1259_p2, %p1258_p1 }
   0xf   :  { %p1261_p4 = pnand %p1260_p3, %p1254_p0 }
  0x11   :  { %1264 = shalt.err (!%p1261_p4)
}
  0x12   :  { %s1335_s21 = smov 512   ;;  %s1336_s22 = smov 32  }
  0x13   :  { %39 = dma.hbm_to_vmem [thread:$0]  %s1605_s2, 8192, %s34_s19, [#allocation9], %s1335_s21, %s1335_s21, %s1336_s22  }
  0x14   :  { %s1337_s24 = smov [#allocation5]  }
  0x15   :  { %s21_s25 = sshll.u32 %s1337_s24, 4  ;;  %s22_s25 = int_to_ptr.vmem [resolvable:$true] %s21_s25 }
  0x16   :  { %s1273_s26 = scalar_lea.vmem %s22_s25, 16384  ;;  %p1278_p6 = scmp.lt.s32.totalorder %s22_s25, %s22_s25 }
  0x17   :  { %p1274_p5 = scmp.ne.s32.totalorder %s22_s25, %s1273_s26  ;;  %p1279_p7 = scmp.lt.s32.totalorder %s1273_s26, %s1273_s26 }
  0x19   :  { %p1280_p8 = por %p1279_p7, %p1278_p6 }
  0x1b   :  { %p1281_p9 = pnand %p1280_p8, %p1274_p5 }
  0x1d   :  { %1284 = shalt.err (!%p1281_p9)
}
  0x1e   :  { %s1338_s27 = smov 128   ;;  %s1339_s28 = smov 8  }
  0x1f   :  { %27 = dma.hbm_to_vmem [thread:$0]  %s1604_s1, 16384, %s22_s25, [#allocation6], %s1338_s27, %s1338_s27, %s1339_s28  }
  0x20   :  { %s1340_s5 = smov [#allocation10]  }
  0x21   :  { %s46_s6 = sshll.u32 %s1340_s5, 4  ;;  %s47_s6 = int_to_ptr.vmem [resolvable:$true] %s46_s6 }
  0x22   :  { %s1293_s2 = scalar_lea.vmem %s47_s6, 128  ;;  %p1298_p11 = scmp.lt.s32.totalorder %s47_s6, %s47_s6 }
  0x23   :  { %p1294_p10 = scmp.ne.s32.totalorder %s47_s6, %s1293_s2  ;;  %p1299_p12 = scmp.lt.s32.totalorder %s1293_s2, %s1293_s2 }
  0x25   :  { %p1300_p13 = por %p1299_p12, %p1298_p11 }
  0x27   :  { %p1301_p0 = pnand %p1300_p13, %p1294_p10 }
  0x29   :  { %1304 = shalt.err (!%p1301_p0)
}
  0x2a   :  { %49 = dma.hbm_to_vmem [thread:$0]  %s1606_s3, 128, %s47_s6, [#allocation9]  }
  0x2b   :  { %1327 = dma.done.wait [#allocation6], 16384  }
  0x2c   :  { %1328 = vsyncadd [#allocation6], 4294950912 }
  0x2d   :  { %1329 = dma.done.wait [#allocation9], 8320  }
  0x2e   :  { %1330 = vsyncadd [#allocation9], 4294958976  ;;  %v1341_v0 = vmov 0   ;;  %s1382_s1 = sld [smem:[#allocation4]]  ;;  %v478_v1 = vld [vmem:[#allocation8 + $0x1c0] sm:$0xff]  ;;  %v479_v3 = vld [vmem:[#allocation8 + $0x1c8] sm:$0xff] }
  0x2f   :  { %880 = vmatprep.mubr.bf16.mxu0 %v1341_v0  ;;  %921 = vmatprep.mubr.bf16.mxu1 %v1341_v0  ;;  %v482_v2 = vld [vmem:[#allocation8 + $0x1e0] sm:$0xff]  ;;  %s1384_s9 = sld [smem:[#allocation4 + $0x1]]  ;;  %v483_v5 = vld [vmem:[#allocation8 + $0x1e8] sm:$0xff]  ;;  %v1430_v62 = vld [vmem:[#allocation8 + $0x1d0] sm:$0xff]  ;;  %vm405_vm0 = vcmask 1040384   ;;  %vm407_vm1 = vcmask 1041408  }
  0x30   :  { %v1220_v4 = vcombine.high %v478_v1, %v482_v2  ;;  %v1219_v6 = vcombine.low %v478_v1, %v482_v2  ;;  %v470_v7 = vld [vmem:[#allocation8 + $0x180] sm:$0xff]  ;;  %s1386_s3 = sld [smem:[#allocation4 + $0x2]]  ;;  %v1222_v9 = vcombine.high %v479_v3, %v483_v5  ;;  %v1221_v10 = vcombine.low %v479_v3, %v483_v5  ;;  %v471_v12 = vld [vmem:[#allocation8 + $0x188] sm:$0xff]  ;;  %v1432_v63 = vld [vmem:[#allocation8 + $0x1f0] sm:$0xff] }
  0x31   :  { %v474_v8 = vld [vmem:[#allocation8 + $0x1a0] sm:$0xff]  ;;  %v475_v13 = vld [vmem:[#allocation8 + $0x1a8] sm:$0xff]  ;;  %s1388_s10 = sld [smem:[#allocation4 + $0x3]]  ;;  %v1436_v2 = vld [vmem:[#allocation8 + $0x1d8] sm:$0xff]  ;;  %vm409_vm2 = vcmask 1042432   ;;  %vm411_vm3 = vcmask 1043456  }
  0x32   :  { %v1212_v11 = vcombine.high %v470_v7, %v474_v8  ;;  %v462_v14 = vld [vmem:[#allocation8 + $0x140] sm:$0xff]  ;;  %848 = vmatprep.subr.bf16.mxu0 %v1220_v4  ;;  %v1214_v15 = vcombine.high %v471_v12, %v475_v13  ;;  %v463_v17 = vld [vmem:[#allocation8 + $0x148] sm:$0xff]  ;;  %s1390_s11 = sld [smem:[#allocation4 + $0x4]]  ;;  %889 = vmatprep.subr.bf16.mxu1 %v1222_v9  ;;  %v1211_v19 = vcombine.low %v470_v7, %v474_v8  ;;  %v1441_v4 = vld [vmem:[#allocation8 + $0x1f8] sm:$0xff]  ;;  %vm413_vm4 = vcmask 1044480  }
  0x33   :  { %v466_v16 = vld [vmem:[#allocation8 + $0x160] sm:$0xff]  ;;  %v467_v18 = vld [vmem:[#allocation8 + $0x168] sm:$0xff]  ;;  %849 = vmatpush1.bf16.msra.mxu0 %v1219_v6  ;;  %s1392_s12 = sld [smem:[#allocation4 + $0x5]]  ;;  %890 = vmatpush1.bf16.msra.mxu1 %v1221_v10  ;;  %v1213_v20 = vcombine.low %v471_v12, %v475_v13  ;;  %v1224_v10 = vcombine.high %v1430_v62, %v1432_v63  ;;  %v1226_v12 = vcombine.high %v1436_v2, %v1441_v4  ;;  %vm415_vm5 = vcmask 1045504  }
  0x34   :  { %850 = vmatprep.subr.bf16.mxu0 %v1212_v11  ;;  %v1204_v21 = vcombine.high %v462_v14, %v466_v16  ;;  %s1394_s13 = sld [smem:[#allocation4 + $0x6]]  ;;  %891 = vmatprep.subr.bf16.mxu1 %v1214_v15  ;;  %v1206_v22 = vcombine.high %v463_v17, %v467_v18  ;;  %v454_v23 = vld [vmem:[#allocation8 + $0x100] sm:$0xff]  ;;  %v455_v25 = vld [vmem:[#allocation8 + $0x108] sm:$0xff]  ;;  %v1203_v27 = vcombine.low %v462_v14, %v466_v16  ;;  %s66_s2 = scalar_lea.vmem [#allocation5], %s1382_s1  ;;  %vm417_vm6 = vcmask 1046528  }
  0x35   :  { %v458_v24 = vld [vmem:[#allocation8 + $0x120] sm:$0xff]  ;;  %s1396_s14 = sld [smem:[#allocation4 + $0x7]]  ;;  %v459_v26 = vld [vmem:[#allocation8 + $0x128] sm:$0xff]  ;;  %v1205_v28 = vcombine.low %v463_v17, %v467_v18  ;;  %v67_v5 = vld [vmem:[%s66_s2] sm:$0x1]  ;;  %s70_s4 = scalar_lea.vmem [#allocation5], %s1384_s9 }
  0x36   :  { %s1398_s15 = sld [smem:[#allocation4 + $0x8]]  ;;  %v1196_v29 = vcombine.high %v454_v23, %v458_v24  ;;  %v1198_v30 = vcombine.high %v455_v25, %v459_v26  ;;  %v446_v31 = vld [vmem:[#allocation8 + $0xc0] sm:$0xff]  ;;  %v447_v33 = vld [vmem:[#allocation8 + $0xc8] sm:$0xff]  ;;  %v1195_v35 = vcombine.low %v454_v23, %v458_v24  ;;  %v1197_v36 = vcombine.low %v455_v25, %v459_v26  ;;  %v71_v8 = vld [vmem:[%s70_s4] sm:$0x1] }
  0x37   :  { %851 = vmatpush1.bf16.msra.mxu0 %v1211_v19  ;;  %s1400_s16 = sld [smem:[#allocation4 + $0x9]]  ;;  %892 = vmatpush1.bf16.msra.mxu1 %v1213_v20  ;;  %v450_v32 = vld [vmem:[#allocation8 + $0xe0] sm:$0xff]  ;;  %v451_v34 = vld [vmem:[#allocation8 + $0xe8] sm:$0xff]  ;;  %v72_v17 = vadd.f32 %v71_v8, %v67_v5 }
  0x38   :  { %852 = vmatprep.subr.bf16.mxu0 %v1204_v21  ;;  %s1402_s17 = sld [smem:[#allocation4 + $0xa]]  ;;  %893 = vmatprep.subr.bf16.mxu1 %v1206_v22  ;;  %v1188_v37 = vcombine.high %v446_v31, %v450_v32  ;;  %v1190_v38 = vcombine.high %v447_v33, %v451_v34  ;;  %v438_v39 = vld [vmem:[#allocation8 + $0x80] sm:$0xff]  ;;  %v439_v41 = vld [vmem:[#allocation8 + $0x88] sm:$0xff]  ;;  %v1187_v43 = vcombine.low %v446_v31, %v450_v32 }
  0x39   :  { %s1404_s18 = sld [smem:[#allocation4 + $0xb]]  ;;  %v442_v40 = vld [vmem:[#allocation8 + $0xa0] sm:$0xff]  ;;  %v443_v42 = vld [vmem:[#allocation8 + $0xa8] sm:$0xff]  ;;  %v1189_v44 = vcombine.low %v447_v33, %v451_v34 }
  0x3a   :  { %s1406_s19 = sld [smem:[#allocation4 + $0xc]]  ;;  %v1180_v45 = vcombine.high %v438_v39, %v442_v40  ;;  %v1182_v46 = vcombine.high %v439_v41, %v443_v42  ;;  %v430_v47 = vld [vmem:[#allocation8 + $0x40] sm:$0xff]  ;;  %v431_v49 = vld [vmem:[#allocation8 + $0x48] sm:$0xff]  ;;  %v1179_v51 = vcombine.low %v438_v39, %v442_v40  ;;  %v1181_v52 = vcombine.low %v439_v41, %v443_v42 }
  0x3b   :  { %853 = vmatpush1.bf16.msra.mxu0 %v1203_v27  ;;  %s1408_s20 = sld [smem:[#allocation4 + $0xd]]  ;;  %894 = vmatpush1.bf16.msra.mxu1 %v1205_v28  ;;  %v434_v48 = vld [vmem:[#allocation8 + $0x60] sm:$0xff]  ;;  %v435_v50 = vld [vmem:[#allocation8 + $0x68] sm:$0xff] }
  0x3c   :  { %854 = vmatprep.subr.bf16.mxu0 %v1196_v29  ;;  %s1410_s21 = sld [smem:[#allocation4 + $0xe]]  ;;  %895 = vmatprep.subr.bf16.mxu1 %v1198_v30  ;;  %v1172_v53 = vcombine.high %v430_v47, %v434_v48  ;;  %v1174_v54 = vcombine.high %v431_v49, %v435_v50  ;;  %v422_v55 = vld [vmem:[#allocation8] sm:$0xff]  ;;  %v423_v57 = vld [vmem:[#allocation8 + $0x8] sm:$0xff]  ;;  %v1171_v59 = vcombine.low %v430_v47, %v434_v48  ;;  %s106_s5 = scalar_lea.vmem [#allocation5], %s1398_s15 }
  0x3d   :  { %s1412_s22 = sld [smem:[#allocation4 + $0xf]]  ;;  %v426_v56 = vld [vmem:[#allocation8 + $0x20] sm:$0xff]  ;;  %v427_v58 = vld [vmem:[#allocation8 + $0x28] sm:$0xff]  ;;  %v1173_v60 = vcombine.low %v431_v49, %v435_v50  ;;  %v107_v3 = vld [vmem:[%s106_s5] sm:$0x1]  ;;  %s110_s7 = scalar_lea.vmem [#allocation5], %s1400_s16 }
  0x3e   :  { %s1414_s23 = sld [smem:[#allocation4 + $0x10]]  ;;  %v1164_v61 = vcombine.high %v422_v55, %v426_v56  ;;  %v1166_v1 = vcombine.high %v423_v57, %v427_v58  ;;  %v111_v6 = vld [vmem:[%s110_s7] sm:$0x1]  ;;  %v1163_v7 = vcombine.low %v422_v55, %v426_v56  ;;  %v1165_v9 = vcombine.low %v423_v57, %v427_v58  ;;  %s75_s16 = scalar_lea.vmem [#allocation5], %s1386_s3 }
  0x3f   :  { %855 = vmatpush1.bf16.msra.mxu0 %v1195_v35  ;;  %s1416_s0 = sld [smem:[#allocation4 + $0x11]]  ;;  %896 = vmatpush1.bf16.msra.mxu1 %v1197_v36  ;;  %v112_v13 = vadd.f32 %v111_v6, %v107_v3  ;;  %v76_v15 = vld [vmem:[%s75_s16] sm:$0x1]  ;;  %s115_s5 = scalar_lea.vmem [#allocation5], %s1402_s17 }
  0x40   :  { %856 = vmatprep.subr.bf16.mxu0 %v1188_v37  ;;  %897 = vmatprep.subr.bf16.mxu1 %v1190_v38  ;;  %s1418_s24 = sld [smem:[#allocation4 + $0x12]]  ;;  %v116_v16 = vld [vmem:[%s115_s5] sm:$0x1]  ;;  %v77_v24 = vadd.f32 %v76_v15, %v72_v17  ;;  %s80_s16 = scalar_lea.vmem [#allocation5], %s1388_s10 }
  0x41   :  { %s1420_s25 = sld [smem:[#allocation4 + $0x13]]  ;;  %v117_v21 = vadd.f32 %v116_v16, %v112_v13  ;;  %v81_v25 = vld [vmem:[%s80_s16] sm:$0x1]  ;;  %s125_s5 = scalar_lea.vmem [#allocation5], %s1406_s19 }
  0x42   :  { %s1422_s26 = sld [smem:[#allocation4 + $0x14]]  ;;  %v126_v27 = vld [vmem:[%s125_s5] sm:$0x1]  ;;  %s85_s10 = scalar_lea.vmem [#allocation5], %s1390_s11  ;;  %v82_v34 = vadd.f32 %v81_v25, %v77_v24 }
  0x43   :  { %857 = vmatpush1.bf16.msra.mxu0 %v1187_v43  ;;  %898 = vmatpush1.bf16.msra.mxu1 %v1189_v44  ;;  %s1424_s27 = sld [smem:[#allocation4 + $0x15]]  ;;  %v86_v32 = vld [vmem:[%s85_s10] sm:$0x1]  ;;  %s90_s5 = scalar_lea.vmem [#allocation5], %s1392_s12 }
  0x44   :  { %858 = vmatprep.subr.bf16.mxu0 %v1180_v45  ;;  %899 = vmatprep.subr.bf16.mxu1 %v1182_v46  ;;  %s1426_s28 = sld [smem:[#allocation4 + $0x16]]  ;;  %s146_s1 = scalar_lea.vmem [#allocation5], %s1414_s23  ;;  %v91_v43 = vld [vmem:[%s90_s5] sm:$0x1]  ;;  %v87_v45 = vadd.f32 %v86_v32, %v82_v34 }
  0x45   :  { %s1428_s29 = sld [smem:[#allocation4 + $0x17]]  ;;  %v147_v11 = vld [vmem:[%s146_s1] sm:$0x1]  ;;  %s150_s4 = scalar_lea.vmem [#allocation5], %s1416_s0 }
  0x46   :  { %s1434_s30 = sld [smem:[#allocation4 + $0x18]]  ;;  %v151_v14 = vld [vmem:[%s150_s4] sm:$0x1]  ;;  %s155_s17 = scalar_lea.vmem [#allocation5], %s1418_s24  ;;  %v92_v58 = vadd.f32 %v91_v43, %v87_v45 }
  0x47   :  { %859 = vmatpush1.bf16.msra.mxu0 %v1179_v51  ;;  %900 = vmatpush1.bf16.msra.mxu1 %v1181_v52  ;;  %s1439_s6 = sld [smem:[#allocation4 + $0x19]]  ;;  %v152_v19 = vadd.f32 %v151_v14, %v147_v11  ;;  %v156_v22 = vld [vmem:[%s155_s17] sm:$0x1] }
  0x48   :  { %860 = vmatprep.subr.bf16.mxu0 %v1172_v53  ;;  %901 = vmatprep.subr.bf16.mxu1 %v1174_v54  ;;  %s1445_s8 = sld [smem:[#allocation4 + $0x1a]] }
  0x49   :  { %s1453_s15 = sld [smem:[#allocation4 + $0x1c]]  ;;  %v157_v28 = vadd.f32 %v156_v22, %v152_v19  ;;  %s170_s10 = scalar_lea.vmem [#allocation5], %s1424_s27 }
  0x4a   :  { %s1458_s9 = sld [smem:[#allocation4 + $0x1d]]  ;;  %v171_v53 = vld [vmem:[%s170_s10] sm:$0x1] }
  0x4b   :  { %1609 = sst [smem:[#allocation16_spill]] %s1428_s29  ;;  %861 = vmatpush1.bf16.msra.mxu0 %v1171_v59  ;;  %902 = vmatpush1.bf16.msra.mxu1 %v1173_v60 }
  0x4c   :  { %s1448_s29 = sld [smem:[#allocation4 + $0x1b]]  ;;  %862 = vmatprep.subr.bf16.mxu0 %v1164_v61  ;;  %903 = vmatprep.subr.bf16.mxu1 %v1166_v1  ;;  %s186_s2 = scalar_lea.vmem [#allocation5], %s1434_s30 }
  0x4d   :  { %s1462_s23 = sld [smem:[#allocation4 + $0x1e]]  ;;  %v187_v18 = vld [vmem:[%s186_s2] sm:$0x1]  ;;  %s190_s0 = scalar_lea.vmem [#allocation5], %s1439_s6 }
  0x4e   :  { %s1465_s7 = sld [smem:[#allocation4 + $0x1f]]  ;;  %v191_v20 = vld [vmem:[%s190_s0] sm:$0x1]  ;;  %s120_s30 = scalar_lea.vmem [#allocation5], %s1404_s18 }
  0x4f   :  { %863 = vmatpush1.bf16.msra.mxu0 %v1163_v7  ;;  %904 = vmatpush1.bf16.msra.mxu1 %v1165_v9  ;;  %s1468_s3 = sld [smem:[#allocation4 + $0x20]]  ;;  %v121_v23 = vld [vmem:[%s120_s30] sm:$0x1]  ;;  %v192_v26 = vadd.f32 %v191_v20, %v187_v18  ;;  %s195_s24 = scalar_lea.vmem [#allocation5], %s1445_s8 }
  0x50   :  { %930 = vmatprep.subr.bf16.mxu0 %v1224_v10  ;;  %971 = vmatprep.subr.bf16.mxu1 %v1226_v12  ;;  %s1471_s1 = sld [smem:[#allocation4 + $0x21]]  ;;  %v196_v29 = vld [vmem:[%s195_s24] sm:$0x1]  ;;  %v122_v30 = vadd.f32 %v121_v23, %v117_v21  ;;  %s160_s18 = scalar_lea.vmem [#allocation5], %s1420_s25 }
  0x51   :  { %s1474_s4 = sld [smem:[#allocation4 + $0x22]]  ;;  %v161_v31 = vld [vmem:[%s160_s18] sm:$0x1]  ;;  %s165_s8 = scalar_lea.vmem [#allocation5], %s1422_s26  ;;  %v197_v36 = vadd.f32 %v196_v29, %v192_v26 }
  0x52   :  { %s1477_s6 = sld [smem:[#allocation4 + $0x23]]  ;;  %s200_s17 = scalar_lea.vmem [#allocation5], %s1448_s29  ;;  %v166_v35 = vld [vmem:[%s165_s8] sm:$0x1]  ;;  %v162_v38 = vadd.f32 %v161_v31, %v157_v28  ;;  %v127_v40 = vadd.f32 %v126_v27, %v122_v30 }
  0x53   :  { %s1481_s2 = sld [smem:[#allocation4 + $0x24]]  ;;  %v201_v33 = vld [vmem:[%s200_s17] sm:$0x1]  ;;  %s205_s12 = scalar_lea.vmem [#allocation5], %s1453_s15 }
  0x54   :  { %s1484_s0 = sld [smem:[#allocation4 + $0x25]]  ;;  %v202_v46 = vadd.f32 %v201_v33, %v197_v36  ;;  %v167_v50 = vadd.f32 %v166_v35, %v162_v38  ;;  %v206_v51 = vld [vmem:[%s205_s12] sm:$0x1]  ;;  %s210_s8 = scalar_lea.vmem [#allocation5], %s1458_s9 }
  0x55   :  { %s1488_s19 = sld [smem:[#allocation4 + $0x26]]  ;;  %s226_s30 = scalar_lea.vmem [#allocation5], %s1468_s3  ;;  %v211_v55 = vld [vmem:[%s210_s8] sm:$0x1] }
  0x56   :  { %v227_v37 = vld [vmem:[%s226_s30] sm:$0x1]  ;;  %s1492_s25 = sld [smem:[#allocation4 + $0x27]]  ;;  %s230_s16 = scalar_lea.vmem [#allocation5], %s1471_s1  ;;  %v207_v60 = vadd.f32 %v206_v51, %v202_v46  ;;  %v172_v3 = vadd.f32 %v171_v53, %v167_v50 }
  0x57   :  { %v231_v39 = vld [vmem:[%s230_s16] sm:$0x1]  ;;  %s1495_s11 = sld [smem:[#allocation4 + $0x28]]  ;;  %s235_s29 = scalar_lea.vmem [#allocation5], %s1474_s4 }
  0x58   :  { %v232_v41 = vadd.f32 %v231_v39, %v227_v37  ;;  %v236_v42 = vld [vmem:[%s235_s29] sm:$0x1]  ;;  %s1498_s26 = sld [smem:[#allocation4 + $0x29]]  ;;  %s130_s3 = scalar_lea.vmem [#allocation5], %s1408_s20  ;;  %v212_v15 = vadd.f32 %v211_v55, %v207_v60 }
  0x59   :  { %v131_v44 = vld [vmem:[%s130_s3] sm:$0x1]  ;;  %s1502_s24 = sld [smem:[#allocation4 + $0x2a]]  ;;  %s240_s1 = scalar_lea.vmem [#allocation5], %s1477_s6 }
  0x5a   :  { %v237_v47 = vadd.f32 %v236_v42, %v232_v41  ;;  %v241_v48 = vld [vmem:[%s240_s1] sm:$0x1]  ;;  %s1505_s18 = sld [smem:[#allocation4 + $0x2b]]  ;;  %s135_s4 = scalar_lea.vmem [#allocation5], %s1410_s21  ;;  %v132_v52 = vadd.f32 %v131_v44, %v127_v40 }
  0x5b   :  { %v136_v49 = vld [vmem:[%s135_s4] sm:$0x1]  ;;  %s1509_s20 = sld [smem:[#allocation4 + $0x2c]]  ;;  %s95_s6 = scalar_lea.vmem [#allocation5], %s1394_s13 }
  0x5c   :  { %s1512_s17 = sld [smem:[#allocation4 + $0x2d]]  ;;  %v96_v54 = vld [vmem:[%s95_s6] sm:$0x1]  ;;  %v242_v56 = vadd.f32 %v241_v48, %v237_v47  ;;  %s245_s21 = scalar_lea.vmem [#allocation5], %s1481_s2  ;;  %v137_v6 = vadd.f32 %v136_v49, %v132_v52 }
  0x5d   :  { %v246_v57 = vld [vmem:[%s245_s21] sm:$0x1]  ;;  %s1517_s15 = sld [smem:[#allocation4 + $0x2e]]  ;;  %s175_s30 = scalar_lea.vmem [#allocation5], %s1426_s28  ;;  %v97_v13 = vadd.f32 %v96_v54, %v92_v58 }
  0x5e   :  { %v176_v59 = vld [vmem:[%s175_s30] sm:$0x1]  ;;  %s266_s27 = scalar_lea.vmem [#allocation5], %s1495_s11  ;;  %s1521_s16 = sld [smem:[#allocation4 + $0x2f]]  ;;  %v247_v11 = vadd.f32 %v246_v57, %v242_v56 }
  0x5f   :  { %v267_v61 = vld [vmem:[%s266_s27] sm:$0x1]  ;;  %s140_s13 = scalar_lea.vmem [#allocation5], %s1412_s22  ;;  %s270_s9 = scalar_lea.vmem [#allocation5], %s1498_s26  ;;  %v177_v18 = vadd.f32 %v176_v59, %v172_v3 }
  0x60   :  { %v141_v1 = vld [vmem:[%s140_s13] sm:$0x1]  ;;  %s1610_s2 = sld [smem:[#allocation16_spill]]  ;;  %s275_s28 = scalar_lea.vmem [#allocation5], %s1502_s24 }
  0x61   :  { %v271_v5 = vld [vmem:[%s270_s9] sm:$0x1]  ;;  %s1525_s29 = sld [smem:[#allocation4 + $0x30]]  ;;  %s100_s11 = scalar_lea.vmem [#allocation5], %s1396_s14  ;;  %v142_v20 = vadd.f32 %v141_v1, %v137_v6 }
  0x62   :  { %v272_v7 = vadd.f32 %v271_v5, %v267_v61  ;;  %v276_v8 = vld [vmem:[%s275_s28] sm:$0x1]  ;;  %s1528_s5 = sld [smem:[#allocation4 + $0x31]]  ;;  %s215_s3 = scalar_lea.vmem [#allocation5], %s1462_s23 }
  0x63   :  { %v101_v9 = vld [vmem:[%s100_s11] sm:$0x1]  ;;  %s280_s22 = scalar_lea.vmem [#allocation5], %s1505_s18  ;;  %s1533_s26 = sld [smem:[#allocation4 + $0x32]]  ;;  %v143_v33 = vmul.f32 0.125, %v142_v20 }
  0x64   :  { %v216_v10 = vld [vmem:[%s215_s3] sm:$0x1]  ;;  %s250_s24 = scalar_lea.vmem [#allocation5], %s1484_s0  ;;  %v277_v17 = vadd.f32 %v276_v8, %v272_v7  ;;  %s1537_s14 = sld [smem:[#allocation4 + $0x33]]  ;;  %v102_v26 = vadd.f32 %v101_v9, %v97_v13 }
  0x65   :  { %v281_v12 = vld [vmem:[%s280_s22] sm:$0x1]  ;;  %s285_s23 = scalar_lea.vmem [#allocation5], %s1509_s20  ;;  %s1540_s18 = sld [smem:[#allocation4 + $0x34]]  ;;  %v217_v27 = vadd.f32 %v216_v10, %v212_v15  ;;  %v385_v48 = vrot.slane %v143_v33, 7  ;;  %v472_v33 = vld [vmem:[#allocation8 + $0x190] sm:$0xff] }
  0x66   :  { %s180_s1 = scalar_lea.vmem [#allocation5], %s1610_s2  ;;  %v251_v16 = vld [vmem:[%s250_s24] sm:$0x1]  ;;  %s255_s4 = scalar_lea.vmem [#allocation5], %s1488_s19  ;;  %v282_v22 = vadd.f32 %v281_v12, %v277_v17  ;;  %v103_v39 = vmul.f32 0.125, %v102_v26 }
  0x67   :  { %v181_v14 = vld [vmem:[%s180_s1] sm:$0x1]  ;;  %s1543_s12 = sld [smem:[#allocation4 + $0x35]]  ;;  %s220_s0 = scalar_lea.vmem [#allocation5], %s1465_s7  ;;  %v252_v24 = vadd.f32 %v251_v16, %v247_v11 }
  0x68   :  { %v286_v19 = vld [vmem:[%s285_s23] sm:$0x1]  ;;  %s290_s10 = scalar_lea.vmem [#allocation5], %s1512_s17  ;;  %s1547_s6 = sld [smem:[#allocation4 + $0x36]]  ;;  %v182_v30 = vadd.f32 %v181_v14, %v177_v18  ;;  %v406_v61 = vsel %vm405_vm0, %v103_v39, %v385_v48 }
  0x69   :  { %v256_v21 = vld [vmem:[%s255_s4] sm:$0x1]  ;;  %v287_v28 = vadd.f32 %v286_v19, %v282_v22  ;;  %s306_s20 = scalar_lea.vmem [#allocation5], %s1525_s29  ;;  %s1550_s19 = sld [smem:[#allocation4 + $0x37]] }
  0x6a   :  { %v221_v23 = vld [vmem:[%s220_s0] sm:$0x1]  ;;  %s295_s8 = scalar_lea.vmem [#allocation5], %s1517_s15  ;;  %s310_s21 = scalar_lea.vmem [#allocation5], %s1528_s5  ;;  %v257_v37 = vadd.f32 %v256_v21, %v252_v24  ;;  %v183_v43 = vmul.f32 0.125, %v182_v30 }
  0x6b   :  { %v291_v25 = vld [vmem:[%s290_s10] sm:$0x1]  ;;  %s1554_s7 = sld [smem:[#allocation4 + $0x38]]  ;;  %s315_s17 = scalar_lea.vmem [#allocation5], %s1533_s26  ;;  %v222_v40 = vadd.f32 %v221_v23, %v217_v27 }
  0x6c   :  { %v307_v29 = vld [vmem:[%s306_s20] sm:$0x1]  ;;  %v292_v34 = vadd.f32 %v291_v25, %v287_v28  ;;  %s1557_s30 = sld [smem:[#allocation4 + $0x39]]  ;;  %s320_s27 = scalar_lea.vmem [#allocation5], %s1537_s14  ;;  %v388_v56 = vrot.slane %v183_v43, 6 }
  0x6d   :  { %v296_v31 = vld [vmem:[%s295_s8] sm:$0x1]  ;;  %s1560_s13 = sld [smem:[#allocation4 + $0x3a]]  ;;  %s260_s15 = scalar_lea.vmem [#allocation5], %s1492_s25  ;;  %v223_v51 = vmul.f32 0.125, %v222_v40 }
  0x6e   :  { %v311_v32 = vld [vmem:[%s310_s21] sm:$0x1]  ;;  %s1563_s9 = sld [smem:[#allocation4 + $0x3b]]  ;;  %s325_s2 = scalar_lea.vmem [#allocation5], %s1540_s18  ;;  %v297_v45 = vadd.f32 %v296_v31, %v292_v34  ;;  %v408_v10 = vsel %vm407_vm1, %v406_v61, %v388_v56  ;;  %v476_v34 = vld [vmem:[#allocation8 + $0x1b0] sm:$0xff] }
  0x6f   :  { %v312_v35 = vadd.f32 %v311_v32, %v307_v29  ;;  %v316_v36 = vld [vmem:[%s315_s17] sm:$0x1]  ;;  %s1566_s29 = sld [smem:[#allocation4 + $0x3c]]  ;;  %s300_s28 = scalar_lea.vmem [#allocation5], %s1521_s16  ;;  %v391_v8 = vrot.slane %v223_v51, 5  ;;  %v1216_v39 = vcombine.high %v472_v33, %v476_v34  ;;  %v440_v61 = vld [vmem:[#allocation8 + $0x90] sm:$0xff] }
  0x70   :  { %v321_v38 = vld [vmem:[%s320_s27] sm:$0x1]  ;;  %s1569_s5 = sld [smem:[#allocation4 + $0x3d]]  ;;  %s330_s25 = scalar_lea.vmem [#allocation5], %s1543_s12 }
  0x71   :  { %v261_v41 = vld [vmem:[%s260_s15] sm:$0x1]  ;;  %v317_v42 = vadd.f32 %v316_v36, %v312_v35  ;;  %s1572_s11 = sld [smem:[#allocation4 + $0x3e]]  ;;  %s346_s3 = scalar_lea.vmem [#allocation5], %s1554_s7  ;;  %v410_v17 = vsel %vm409_vm2, %v408_v10, %v391_v8  ;;  %v432_v10 = vld [vmem:[#allocation8 + $0x50] sm:$0xff] }
  0x72   :  { %v326_v44 = vld [vmem:[%s325_s2] sm:$0x1]  ;;  %v262_v49 = vadd.f32 %v261_v41, %v257_v37  ;;  %s1575_s16 = sld [smem:[#allocation4 + $0x3f]]  ;;  %s335_s22 = scalar_lea.vmem [#allocation5], %s1547_s6  ;;  %v1223_v37 = vcombine.low %v1430_v62, %v1432_v63  ;;  %v464_v41 = vld [vmem:[#allocation8 + $0x150] sm:$0xff] }
  0x73   :  { %v301_v46 = vld [vmem:[%s300_s28] sm:$0x1]  ;;  %v322_v47 = vadd.f32 %v321_v38, %v317_v42  ;;  %s350_s26 = scalar_lea.vmem [#allocation5], %s1557_s30  ;;  %s355_s1 = scalar_lea.vmem [#allocation5], %s1560_s13  ;;  %v1225_v38 = vcombine.low %v1436_v2, %v1441_v4  ;;  %v468_v42 = vld [vmem:[#allocation8 + $0x170] sm:$0xff] }
  0x74   :  { %v331_v50 = vld [vmem:[%s330_s25] sm:$0x1]  ;;  %v302_v57 = vadd.f32 %v301_v46, %v297_v45  ;;  %v263_v1 = vmul.f32 0.125, %v262_v49  ;;  %s340_s24 = scalar_lea.vmem [#allocation5], %s1550_s19  ;;  %s360_s14 = scalar_lea.vmem [#allocation5], %s1563_s9  ;;  %v1215_v46 = vcombine.low %v472_v33, %v476_v34  ;;  %v1208_v62 = vcombine.high %v464_v41, %v468_v42  ;;  %v456_v2 = vld [vmem:[#allocation8 + $0x110] sm:$0xff] }
  0x75   :  { %v327_v52 = vadd.f32 %v326_v44, %v322_v47  ;;  %v347_v53 = vld [vmem:[%s346_s3] sm:$0x1]  ;;  %s365_s23 = scalar_lea.vmem [#allocation5], %s1566_s29  ;;  %v460_v4 = vld [vmem:[#allocation8 + $0x130] sm:$0xff]  ;;  %s1342_s0 = smov [#allocation11]  }
  0x76   :  { %v336_v54 = vld [vmem:[%s335_s22] sm:$0x1]  ;;  %v303_v11 = vmul.f32 0.125, %v302_v57  ;;  %s370_s18 = scalar_lea.vmem [#allocation5], %s1569_s5  ;;  %v394_v15 = vrot.slane %v263_v1, 4  ;;  %v444_v1 = vld [vmem:[#allocation8 + $0xb0] sm:$0xff] }
  0x77   :  { %v351_v55 = vld [vmem:[%s350_s26] sm:$0x1]  ;;  %v332_v58 = vadd.f32 %v331_v50, %v327_v52  ;;  %s375_s4 = scalar_lea.vmem [#allocation5], %s1572_s11  ;;  %v1207_v50 = vcombine.low %v464_v41, %v468_v42  ;;  %v1200_v52 = vcombine.high %v456_v2, %v460_v4  ;;  %v1184_v8 = vcombine.high %v440_v61, %v444_v1  ;;  %s1026_s10 = sshll.u32 %s1342_s0, 4  ;;  %s1027_s10 = int_to_ptr.vmem [resolvable:$true] %s1026_s10 }
  0x78   :  { %v352_v59 = vadd.f32 %v351_v55, %v347_v53  ;;  %v356_v60 = vld [vmem:[%s355_s1] sm:$0x1]  ;;  %v397_v21 = vrot.slane %v303_v11, 3  ;;  %s380_s12 = scalar_lea.vmem [#allocation5], %s1575_s16  ;;  %v412_v23 = vsel %vm411_vm3, %v410_v17, %v394_v15  ;;  %v452_v55 = vld [vmem:[#allocation8 + $0xf0] sm:$0xff]  ;;  %s1305_s6 = scalar_lea.vmem %s1027_s10, 1024 }
  0x79   :  { %v341_v3 = vld [vmem:[%s340_s24] sm:$0x1]  ;;  %v337_v6 = vadd.f32 %v336_v54, %v332_v58  ;;  %v448_v54 = vld [vmem:[#allocation8 + $0xd0] sm:$0xff]  ;;  %v1199_v58 = vcombine.low %v456_v2, %v460_v4  ;;  %p1306_p1 = scmp.ne.s32.totalorder %s1027_s10, %s1305_s6  ;;  %p1310_p2 = scmp.lt.s32.totalorder %s1027_s10, %s1027_s10 }
  0x7a   :  { %v361_v5 = vld [vmem:[%s360_s14] sm:$0x1]  ;;  %v357_v7 = vadd.f32 %v356_v60, %v352_v59  ;;  %v414_v27 = vsel %vm413_vm4, %v412_v23, %v397_v21  ;;  %v1192_v60 = vcombine.high %v448_v54, %v452_v55  ;;  %v436_v11 = vld [vmem:[#allocation8 + $0x70] sm:$0xff]  ;;  %p1311_p3 = scmp.lt.s32.totalorder %s1305_s6, %s1305_s6 }
  0x7b   :  { %v366_v9 = vld [vmem:[%s365_s23] sm:$0x1]  ;;  %v342_v12 = vadd.f32 %v341_v3, %v337_v6  ;;  %v1191_v6 = vcombine.low %v448_v54, %v452_v55 }
  0x7c   :  { %v362_v13 = vadd.f32 %v361_v5, %v357_v7  ;;  %v371_v14 = vld [vmem:[%s370_s18] sm:$0x1]  ;;  %p1312_p4 = por %p1311_p3, %p1310_p2 }
  0x7d   :  { %v343_v18 = vmul.f32 0.125, %v342_v12  ;;  %v376_v19 = vld [vmem:[%s375_s4] sm:$0x1] }
  0x7e   :  { %v367_v16 = vadd.f32 %v366_v9, %v362_v13  ;;  %v381_v22 = vld [vmem:[%s380_s12] sm:$0x1]  ;;  %p1313_p5 = pnand %p1312_p4, %p1306_p1 }
  0x7f   :  { %v400_v25 = vrot.slane %v343_v18, 2  ;;  %v473_v35 = vld [vmem:[#allocation8 + $0x198] sm:$0xff]  ;;  %v424_v18 = vld [vmem:[#allocation8 + $0x10] sm:$0xff] }
  0x80   :  { %v372_v20 = vadd.f32 %v371_v14, %v367_v16  ;;  %v477_v36 = vld [vmem:[#allocation8 + $0x1b8] sm:$0xff]  ;;  %v1183_v14 = vcombine.low %v440_v61, %v444_v1  ;;  %v1176_v16 = vcombine.high %v432_v10, %v436_v11 }
  0x81   :  { %v416_v29 = vsel %vm415_vm5, %v414_v27, %v400_v25  ;;  %v1218_v40 = vcombine.high %v473_v35, %v477_v36  ;;  %v465_v44 = vld [vmem:[#allocation8 + $0x158] sm:$0xff]  ;;  %v1217_v47 = vcombine.low %v473_v35, %v477_v36 }
  0x82   :  { %v377_v24 = vadd.f32 %v376_v19, %v372_v20  ;;  %v469_v45 = vld [vmem:[#allocation8 + $0x178] sm:$0xff]  ;;  %v428_v19 = vld [vmem:[#allocation8 + $0x30] sm:$0xff] }
  0x83   :  { %v1210_v63 = vcombine.high %v465_v44, %v469_v45  ;;  %v457_v48 = vld [vmem:[#allocation8 + $0x118] sm:$0xff]  ;;  %v1209_v51 = vcombine.low %v465_v44, %v469_v45 }
  0x84   :  { %v382_v26 = vadd.f32 %v381_v22, %v377_v24  ;;  %v461_v49 = vld [vmem:[#allocation8 + $0x138] sm:$0xff]  ;;  %v1175_v22 = vcombine.low %v432_v10, %v436_v11  ;;  %v1168_v24 = vcombine.high %v424_v18, %v428_v19 }
  0x85   :  { %v1202_v53 = vcombine.high %v457_v48, %v461_v49  ;;  %v449_v56 = vld [vmem:[#allocation8 + $0xd8] sm:$0xff]  ;;  %v1201_v59 = vcombine.low %v457_v48, %v461_v49 }
  0x86   :  { %v383_v28 = vmul.f32 0.125, %v382_v26  ;;  %v453_v57 = vld [vmem:[#allocation8 + $0xf8] sm:$0xff]  ;;  %v1167_v26 = vcombine.low %v424_v18, %v428_v19 }
  0x87   :  { %v441_v3 = vld [vmem:[#allocation8 + $0x98] sm:$0xff]  ;;  %v1193_v7 = vcombine.low %v449_v56, %v453_v57 }
  0x88   :  { %v403_v30 = vrot.slane %v383_v28, 1  ;;  %v445_v5 = vld [vmem:[#allocation8 + $0xb8] sm:$0xff]  ;;  %v488_v28 = vlaneseq }
  0x89   :  { %v1186_v9 = vcombine.high %v441_v3, %v445_v5  ;;  %v433_v12 = vld [vmem:[#allocation8 + $0x58] sm:$0xff]  ;;  %v1185_v15 = vcombine.low %v441_v3, %v445_v5 }
  0x8a   :  { %v418_v31 = vsel %vm417_vm6, %v416_v29, %v403_v30  ;;  %v437_v13 = vld [vmem:[#allocation8 + $0x78] sm:$0xff]  ;;  %v489_v29 = vshrl.u32 %v488_v28, 7 }
  0x8b   :  { %v419_v32 = vpack.c.bf16 %v418_v31, %v418_v31  ;;  %v1178_v17 = vcombine.high %v433_v12, %v437_v13  ;;  %v425_v20 = vld [vmem:[#allocation8 + $0x18] sm:$0xff]  ;;  %v1177_v23 = vcombine.low %v433_v12, %v437_v13 }
  0x8c   :  { %v429_v21 = vld [vmem:[#allocation8 + $0x38] sm:$0xff]  ;;  %v490_v30 = vsub.s32 0, %v489_v29  ;;  %v498_v31 = vsub.s32 2, %v489_v29  ;;  %v494_v33 = vsub.s32 1, %v489_v29  ;;  %v502_v34 = vsub.s32 3, %v489_v29 }
  0x8d   :  { %420 = vst [vmem:[#allocation2] sm:$0xf] %v419_v32  ;;  %v1170_v25 = vcombine.high %v425_v20, %v429_v21  ;;  %v1169_v27 = vcombine.low %v425_v20, %v429_v21  ;;  %v486_v32 = vld [vmem:[#allocation10] sm:$0xff]  ;;  %v506_v4 = vsub.s32 4, %v489_v29  ;;  %v514_v48 = vsub.s32 6, %v489_v29 }
  0x8e   :  { %v491_v35 = vrot.slane %v486_v32, %v490_v30  ;;  %v499_v36 = vrot.slane %v486_v32, %v498_v31  ;;  %v510_v49 = vsub.s32 5, %v489_v29 }
  0x94   :  { %v1592_v43 = vld [vmem:[#allocation2] sm:$0xf] }
  0x95   :  { %881 = vmatmul.mubr.bf16.vlgmr.msra.gmra.mxu0 %v1592_v43  ;;  %922 = vmatmul.mubr.bf16.vlgmr.msra.gmra.mxu1 %v1592_v43 }
  0x96   :  { %931 = vmatpush1.bf16.msra.mxu0 %v1223_v37  ;;  %972 = vmatpush1.bf16.msra.mxu1 %v1225_v38  ;;  %v495_v37 = vrot.slane %v486_v32, %v494_v33  ;;  %v503_v38 = vrot.slane %v486_v32, %v502_v34 }
  0x97   :  { %932 = vmatprep.subr.bf16.mxu0 %v1216_v39  ;;  %973 = vmatprep.subr.bf16.mxu1 %v1218_v40 }
  0x98   :  { %962 = vmatprep.mubr.bf16.mxu0 %v1341_v0  ;;  %1003 = vmatprep.mubr.bf16.mxu1 %v1341_v0  ;;  %v1194_v0 = vcombine.high %v449_v56, %v453_v57 }
  0x9a   :  { %933 = vmatpush1.bf16.msra.mxu0 %v1215_v46  ;;  %974 = vmatpush1.bf16.msra.mxu1 %v1217_v47 }
  0x9b   :  { %934 = vmatprep.subr.bf16.mxu0 %v1208_v62  ;;  %975 = vmatprep.subr.bf16.mxu1 %v1210_v63 }
  0x9e   :  { %935 = vmatpush1.bf16.msra.mxu0 %v1207_v50  ;;  %976 = vmatpush1.bf16.msra.mxu1 %v1209_v51  ;;  %v518_v50 = vsub.s32 7, %v489_v29  ;;  %v507_v51 = vrot.slane %v486_v32, %v506_v4 }
  0x9f   :  { %936 = vmatprep.subr.bf16.mxu0 %v1200_v52  ;;  %977 = vmatprep.subr.bf16.mxu1 %v1202_v53  ;;  %v515_v52 = vrot.slane %v486_v32, %v514_v48  ;;  %v511_v53 = vrot.slane %v486_v32, %v510_v49 }
  0xa0   :  { %v519_v54 = vrot.slane %v486_v32, %v518_v50 }
  0xa2   :  { %937 = vmatpush1.bf16.msra.mxu0 %v1199_v58  ;;  %978 = vmatpush1.bf16.msra.mxu1 %v1201_v59 }
  0xa3   :  { %938 = vmatprep.subr.bf16.mxu0 %v1192_v60  ;;  %979 = vmatprep.subr.bf16.mxu1 %v1194_v0 }
  0xa6   :  { %939 = vmatpush1.bf16.msra.mxu0 %v1191_v6  ;;  %980 = vmatpush1.bf16.msra.mxu1 %v1193_v7 }
  0xa7   :  { %940 = vmatprep.subr.bf16.mxu0 %v1184_v8  ;;  %981 = vmatprep.subr.bf16.mxu1 %v1186_v9 }
  0xaa   :  { %941 = vmatpush1.bf16.msra.mxu0 %v1183_v14  ;;  %982 = vmatpush1.bf16.msra.mxu1 %v1185_v15 }
  0xab   :  { %942 = vmatprep.subr.bf16.mxu0 %v1176_v16  ;;  %983 = vmatprep.subr.bf16.mxu1 %v1178_v17 }
  0xae   :  { %943 = vmatpush1.bf16.msra.mxu0 %v1175_v22  ;;  %984 = vmatpush1.bf16.msra.mxu1 %v1177_v23 }
  0xaf   :  { %944 = vmatprep.subr.bf16.mxu0 %v1168_v24  ;;  %985 = vmatprep.subr.bf16.mxu1 %v1170_v25 }
  0xb2   :  { %945 = vmatpush1.bf16.msra.mxu0 %v1167_v26  ;;  %986 = vmatpush1.bf16.msra.mxu1 %v1169_v27 }
  0xb5   :  { %963 = vmatmul.mubr.bf16.vlgmr.msra.gmra.mxu0 %v1592_v43  ;;  %1004 = vmatmul.mubr.bf16.vlgmr.msra.gmra.mxu1 %v1592_v43 }
 0x155   :  { %v882_v39 = vpop.f32.mrf.mxu0  ;;  %v923_v40 = vpop.f32.mrf.mxu1 }
 0x156   :  { %v883_v41 = vadd.f32 %v882_v39, %v491_v35  ;;  %v924_v42 = vadd.f32 %v923_v40, %v499_v36 }
 0x157   :  { %v884_v44 = vpop.f32.mrf.mxu0  ;;  %v925_v45 = vpop.f32.mrf.mxu1 }
 0x158   :  { %1012 = vst [vmem:[#allocation11] sm:$0xff] %v883_v41  ;;  %1014 = vst [vmem:[#allocation11 + $0x10] sm:$0xff] %v924_v42  ;;  %v885_v43 = vadd.f32 %v884_v44, %v495_v37  ;;  %v926_v46 = vadd.f32 %v925_v45, %v503_v38 }
 0x159   :  { %v886_v47 = vpop.f32.mrf.mxu0  ;;  %v927_v62 = vpop.f32.mrf.mxu1 }
 0x15a   :  { %1013 = vst [vmem:[#allocation11 + $0x8] sm:$0xff] %v885_v43  ;;  %1015 = vst [vmem:[#allocation11 + $0x18] sm:$0xff] %v926_v46 }
 0x15b   :  { %v887_v63 = vpop.f32.mrf.mxu0  ;;  %v928_v2 = vpop.f32.mrf.mxu1 }
 0x175   :  { %v964_v55 = vpop.f32.mrf.mxu0  ;;  %v1005_v56 = vpop.f32.mrf.mxu1 }
 0x176   :  { %v965_v57 = vadd.f32 %v964_v55, %v507_v51  ;;  %v1006_v58 = vadd.f32 %v1005_v56, %v515_v52 }
 0x177   :  { %v966_v59 = vpop.f32.mrf.mxu0  ;;  %v1007_v60 = vpop.f32.mrf.mxu1 }
 0x178   :  { %1016 = vst [vmem:[#allocation11 + $0x20] sm:$0xff] %v965_v57  ;;  %1018 = vst [vmem:[#allocation11 + $0x30] sm:$0xff] %v1006_v58  ;;  %v967_v0 = vadd.f32 %v966_v59, %v511_v53  ;;  %v1008_v61 = vadd.f32 %v1007_v60, %v519_v54 }
 0x179   :  { %v968_v1 = vpop.f32.mrf.mxu0  ;;  %v1009_v3 = vpop.f32.mrf.mxu1 }
 0x17a   :  { %1017 = vst [vmem:[#allocation11 + $0x28] sm:$0xff] %v967_v0  ;;  %1019 = vst [vmem:[#allocation11 + $0x38] sm:$0xff] %v1008_v61 }
 0x17b   :  { %v969_v5 = vpop.f32.mrf.mxu0  ;;  %v1010_v6 = vpop.f32.mrf.mxu1 }
 0x17c   :  { %1316 = shalt.err (!%p1313_p5)
}
 0x17d   :  { %s1611_s8 = sld [smem:[#allocation17_spill]] }
 0x183   :  { %1029 = dma.vmem_to_hbm [thread:$0]  %s1027_s10, 1024, %s1611_s8, [#allocation7]  }
 0x184   :  { %1331 = dma.done.wait [#allocation7], 1024  }
 0x185   :  { %1332 = vsyncadd [#allocation7], 4294966272 }
 0x186   :  { %1033 = vsyncpa [#allocation6], 1 }
 0x187   :  { %1034 = vsyncpa [#allocation9], 1 }
 0x188   :  { %1035 = vsyncpa [#allocation7], 1 }

</bundles_post_ra>
